<compile_context>
chip_gen: v6e
topology: v6e:2x2x1
jax: 0.10.0
libtpu: 0.0.40
codegen_flags: <defaults>
</compile_context>

<pallas_src>
import functools

import jax
import jax.numpy as jnp
from jax.experimental import pallas as pl
from jax.experimental.pallas import tpu as pltpu

IN = 28 * 28      # 784
H = 512
OUT_PAD = 128     # 10 padded up to a full lane width


def mlp_kernel(x_ref, w1_ref, b1_ref, w2_ref, b2_ref, w3_ref, b3_ref, o_ref):
    # In-kernel f32 -> bf16 cast of the x tile (avoids a separate XLA pre-pass).
    x = x_ref[...].astype(jnp.bfloat16)                       # (tm, 784)
    # Layer 1: (tm,784)bf16 @ (784,512)bf16 -> f32 acc, bias+ReLU in f32.
    h1 = jnp.dot(x, w1_ref[...], preferred_element_type=jnp.float32)
    h1 = jnp.maximum(h1 + b1_ref[...], 0.0)
    # Dropout(0.25) -> identity in eval mode.
    # Layer 2: (tm,512)bf16 @ (512,512)bf16 -> f32.
    h2 = jnp.dot(h1.astype(jnp.bfloat16), w2_ref[...],
                 preferred_element_type=jnp.float32)
    h2 = jnp.maximum(h2 + b2_ref[...], 0.0)
    # Dropout(0.25) -> identity in eval mode.
    # Layer 3: (tm,512)bf16 @ (512,128)bf16 -> f32 (cols 10..127 are zero pad).
    h3 = jnp.dot(h2.astype(jnp.bfloat16), w3_ref[...],
                 preferred_element_type=jnp.float32)
    # bf16 lane-dense store; wrapper slices [:, :10].
    o_ref[...] = jnp.maximum(h3 + b3_ref[...], 0.0).astype(o_ref.dtype)


def _round16(n):
    return max(16, ((n + 15) // 16) * 16)


def _pick_tm(B, tm_max):
    """Batch-tile heuristic: >=2 grid steps when possible (v7x 2 TCs), rows a
    multiple of 16 (bf16 sublane packing), minimal zero-pad rows, tiles as
    large as possible (amortize ~0.35us/step), capped at tm_max."""
    b16 = _round16(B)
    if b16 <= 2 * tm_max:
        if b16 <= 16:
            return 16
        return min(tm_max, _round16((b16 + 1) // 2))
    # Very large batch: minimize padded rows, prefer larger tiles.
    cands = range(128, tm_max + 1, 16)
    return min(cands, key=lambda t: (pl.cdiv(B, t) * t - B, -t))


@functools.partial(jax.jit, static_argnames=("tm_max",))
def mlp_forward(x_nchw, packed_params, tm_max=512):
    """x_nchw: (B, 1, 28, 28) float32.  Returns (B, 10) float32."""
    B = x_nchw.shape[0]
    x = x_nchw.reshape(B, IN)                       # f32; cast happens in-kernel
    w1, b1, w2, b2, w3p, b3p = packed_params

    tm = _pick_tm(B, tm_max)
    grid = pl.cdiv(B, tm)
    b_pad = grid * tm
    if b_pad != B:                                  # pad batch only when needed
        x = jnp.pad(x, ((0, b_pad - B), (0, 0)))

    const = lambda shape: pl.BlockSpec(shape, lambda i: (0,) * len(shape))

    out_padded = pl.pallas_call(
        mlp_kernel,
        out_shape=jax.ShapeDtypeStruct((b_pad, OUT_PAD), jnp.bfloat16),
        grid_spec=pltpu.PrefetchScalarGridSpec(
            num_scalar_prefetch=0,
            grid=(grid,),
            in_specs=[
                pl.BlockSpec((tm, IN), lambda i: (i, 0)),   # x tile (f32)
                const((IN, H)), const((1, H)),              # W1, b1 (resident)
                const((H, H)), const((1, H)),               # W2, b2
                const((H, OUT_PAD)), const((1, OUT_PAD)),   # W3, b3 (padded)
            ],
            out_specs=pl.BlockSpec((tm, OUT_PAD), lambda i: (i, 0)),
        ),
        compiler_params=pltpu.CompilerParams(
            dimension_semantics=("parallel",),
        ),
    )(x, w1, b1, w2, b2, w3p, b3p)

    return out_padded[:B, :10].astype(jnp.float32)


def init_params(key):
    """Deterministic PyTorch-style init; Linear weight (out,in) stored transposed."""
    ks = jax.random.split(key, 6)

    def linear(kw, kb, fan_in, fan_out):
        bound = 1.0 / jnp.sqrt(fan_in)
        w = jax.random.uniform(kw, (fan_in, fan_out), jnp.float32, -bound, bound)
        b = jax.random.uniform(kb, (1, fan_out), jnp.float32, -bound, bound)
        return w, b

    w1, b1 = linear(ks[0], ks[1], IN, H)
    w2, b2 = linear(ks[2], ks[3], H, H)
    w3, b3 = linear(ks[4], ks[5], H, 10)
    return (w1, b1, w2, b2, w3, b3)


def pack_params(params):
    """Cast weights to bf16; pad W3/b3 out-dim 10 -> 128 (zero columns)."""
    w1, b1, w2, b2, w3, b3 = params
    w3p = jnp.zeros((H, OUT_PAD), jnp.float32).at[:, :10].set(w3).astype(jnp.bfloat16)
    b3p = jnp.zeros((1, OUT_PAD), jnp.float32).at[:, :10].set(b3)
    return (w1.astype(jnp.bfloat16), b1,
            w2.astype(jnp.bfloat16), b2,
            w3p, b3p)


def reference_forward(x_nchw, packed_params):
    """Plain-JAX reference using the same bf16-rounded operands, f32 math."""
    w1, b1, w2, b2, w3p, b3p = packed_params
    f32 = lambda a: a.astype(jnp.float32)
    bf = lambda a: a.astype(jnp.bfloat16).astype(jnp.float32)
    x = bf(x_nchw.reshape(x_nchw.shape[0], -1))
    h = jnp.maximum(x @ f32(w1) + b1, 0.0)
    h = jnp.maximum(bf(h) @ f32(w2) + b2, 0.0)
    h = jnp.maximum(bf(h) @ f32(w3p) + b3p, 0.0)
    return bf(h)[:, :10]     # kernel stores bf16 logits


if __name__ == "__main__":
    key = jax.random.PRNGKey(0)
    k_x, k_p = jax.random.split(key)

    B = 32  # small batch; exercises a 2-step grid (tm=16). Large B tiles automatically.
    x = jax.random.normal(k_x, (B, 1, 28, 28), jnp.float32)  # NCHW, like MNIST
    packed = pack_params(init_params(k_p))

    out = jax.block_until_ready(mlp_forward(x, packed))
    ref = reference_forward(x, packed)

    assert out.shape == (B, 10), out.shape
    assert jnp.allclose(out, ref, atol=2e-2, rtol=2e-2), "mismatch vs reference"
    print("KERNEL_OK")
</pallas_src>

<mosaic_0001>
module attributes {stable_mosaic.version = 11 : i64} {
  func.func @mlp_kernel(%arg0: i32, %arg1: memref<16x784xf32, #tpu.memory_space<vmem>>, %arg2: memref<784x512xbf16, #tpu.memory_space<vmem>>, %arg3: memref<1x512xf32, #tpu.memory_space<vmem>>, %arg4: memref<512x512xbf16, #tpu.memory_space<vmem>>, %arg5: memref<1x512xf32, #tpu.memory_space<vmem>>, %arg6: memref<512x128xbf16, #tpu.memory_space<vmem>>, %arg7: memref<1x128xf32, #tpu.memory_space<vmem>>, %arg8: memref<16x128xbf16, #tpu.memory_space<vmem>>) attributes {dimension_semantics = [#tpu.dimension_semantics<parallel>], iteration_bounds = array<i64: 2>, scalar_prefetch = 0 : i64, scratch_operands = 0 : i64, tpu.core_type = #tpu.core_type<tc>, window_params = [{transform_indices = @transform_0, window_bounds = array<i64: 16, 784>}, {pipeline_mode = #tpu.pipeline_mode<synchronous>, transform_indices = @transform_1, window_bounds = array<i64: 784, 512>}, {pipeline_mode = #tpu.pipeline_mode<synchronous>, transform_indices = @transform_2, window_bounds = array<i64: 1, 512>}, {pipeline_mode = #tpu.pipeline_mode<synchronous>, transform_indices = @transform_3, window_bounds = array<i64: 512, 512>}, {pipeline_mode = #tpu.pipeline_mode<synchronous>, transform_indices = @transform_4, window_bounds = array<i64: 1, 512>}, {pipeline_mode = #tpu.pipeline_mode<synchronous>, transform_indices = @transform_5, window_bounds = array<i64: 512, 128>}, {pipeline_mode = #tpu.pipeline_mode<synchronous>, transform_indices = @transform_6, window_bounds = array<i64: 1, 128>}, {transform_indices = @transform_7, window_bounds = array<i64: 16, 128>}]} {
    %c0 = arith.constant 0 : index
    %c0_0 = arith.constant 0 : index
    %0 = vector.load %arg1[%c0, %c0_0] : memref<16x784xf32, #tpu.memory_space<vmem>>, vector<16x784xf32>
    %1 = arith.truncf %0 : vector<16x784xf32> to vector<16x784xbf16>
    %c0_1 = arith.constant 0 : index
    %c0_2 = arith.constant 0 : index
    %2 = vector.load %arg2[%c0_1, %c0_2] : memref<784x512xbf16, #tpu.memory_space<vmem>>, vector<784x512xbf16>
    %cst = arith.constant dense<0.000000e+00> : vector<16x512xf32>
    %3 = tpu.matmul %1, %2, %cst {dimension_numbers = #tpu.dot_dimension_numbers<[1], [0], [0], [1], [0, 0, 1, 1], [], []>} : vector<16x784xbf16>, vector<784x512xbf16>, vector<16x512xf32> -> vector<16x512xf32>
    %c0_3 = arith.constant 0 : index
    %c0_4 = arith.constant 0 : index
    %4 = vector.load %arg3[%c0_3, %c0_4] : memref<1x512xf32, #tpu.memory_space<vmem>>, vector<1x512xf32>
    %5 = vector.broadcast %4 : vector<1x512xf32> to vector<16x512xf32>
    %6 = arith.addf %3, %5 : vector<16x512xf32>
    %cst_5 = arith.constant 0.000000e+00 : f32
    %7 = vector.broadcast %cst_5 : f32 to vector<16x512xf32>
    %8 = arith.maximumf %6, %7 : vector<16x512xf32>
    %9 = arith.truncf %8 : vector<16x512xf32> to vector<16x512xbf16>
    %c0_6 = arith.constant 0 : index
    %c0_7 = arith.constant 0 : index
    %10 = vector.load %arg4[%c0_6, %c0_7] : memref<512x512xbf16, #tpu.memory_space<vmem>>, vector<512x512xbf16>
    %cst_8 = arith.constant dense<0.000000e+00> : vector<16x512xf32>
    %11 = tpu.matmul %9, %10, %cst_8 {dimension_numbers = #tpu.dot_dimension_numbers<[1], [0], [0], [1], [0, 0, 1, 1], [], []>} : vector<16x512xbf16>, vector<512x512xbf16>, vector<16x512xf32> -> vector<16x512xf32>
    %c0_9 = arith.constant 0 : index
    %c0_10 = arith.constant 0 : index
    %12 = vector.load %arg5[%c0_9, %c0_10] : memref<1x512xf32, #tpu.memory_space<vmem>>, vector<1x512xf32>
    %13 = vector.broadcast %12 : vector<1x512xf32> to vector<16x512xf32>
    %14 = arith.addf %11, %13 : vector<16x512xf32>
    %cst_11 = arith.constant 0.000000e+00 : f32
    %15 = vector.broadcast %cst_11 : f32 to vector<16x512xf32>
    %16 = arith.maximumf %14, %15 : vector<16x512xf32>
    %17 = arith.truncf %16 : vector<16x512xf32> to vector<16x512xbf16>
    %c0_12 = arith.constant 0 : index
    %c0_13 = arith.constant 0 : index
    %18 = vector.load %arg6[%c0_12, %c0_13] : memref<512x128xbf16, #tpu.memory_space<vmem>>, vector<512x128xbf16>
    %cst_14 = arith.constant dense<0.000000e+00> : vector<16x128xf32>
    %19 = tpu.matmul %17, %18, %cst_14 {dimension_numbers = #tpu.dot_dimension_numbers<[1], [0], [0], [1], [0, 0, 1, 1], [], []>} : vector<16x512xbf16>, vector<512x128xbf16>, vector<16x128xf32> -> vector<16x128xf32>
    %c0_15 = arith.constant 0 : index
    %c0_16 = arith.constant 0 : index
    %20 = vector.load %arg7[%c0_15, %c0_16] : memref<1x128xf32, #tpu.memory_space<vmem>>, vector<1x128xf32>
    %21 = vector.broadcast %20 : vector<1x128xf32> to vector<16x128xf32>
    %22 = arith.addf %19, %21 : vector<16x128xf32>
    %cst_17 = arith.constant 0.000000e+00 : f32
    %23 = vector.broadcast %cst_17 : f32 to vector<16x128xf32>
    %24 = arith.maximumf %22, %23 : vector<16x128xf32>
    %25 = arith.truncf %24 : vector<16x128xf32> to vector<16x128xbf16>
    %c0_18 = arith.constant 0 : index
    %c0_19 = arith.constant 0 : index
    %26 = vector.load %arg8[%c0_18, %c0_19] : memref<16x128xbf16, #tpu.memory_space<vmem>>, vector<16x128xbf16>
    tpu.vector_store %arg8[%c0_18, %c0_19], %25 {strides = array<i32>} : memref<16x128xbf16, #tpu.memory_space<vmem>>, vector<16x128xbf16>,
    return
  }
  func.func @transform_0(%arg0: i32) -> (i32, i32) {
    %c0_i32 = arith.constant 0 : i32
    %c0_i32_0 = arith.constant 0 : i32
    return %arg0, %c0_i32 : i32, i32
  }
  func.func @transform_1(%arg0: i32) -> (i32, i32) {
    %c0_i32 = arith.constant 0 : i32
    %c0_i32_0 = arith.constant 0 : i32
    %c0_i32_1 = arith.constant 0 : i32
    return %c0_i32, %c0_i32_0 : i32, i32
  }
  func.func @transform_2(%arg0: i32) -> (i32, i32) {
    %c0_i32 = arith.constant 0 : i32
    %c0_i32_0 = arith.constant 0 : i32
    %c0_i32_1 = arith.constant 0 : i32
    return %c0_i32, %c0_i32_0 : i32, i32
  }
  func.func @transform_3(%arg0: i32) -> (i32, i32) {
    %c0_i32 = arith.constant 0 : i32
    %c0_i32_0 = arith.constant 0 : i32
    %c0_i32_1 = arith.constant 0 : i32
    return %c0_i32, %c0_i32_0 : i32, i32
  }
  func.func @transform_4(%arg0: i32) -> (i32, i32) {
    %c0_i32 = arith.constant 0 : i32
    %c0_i32_0 = arith.constant 0 : i32
    %c0_i32_1 = arith.constant 0 : i32
    return %c0_i32, %c0_i32_0 : i32, i32
  }
  func.func @transform_5(%arg0: i32) -> (i32, i32) {
    %c0_i32 = arith.constant 0 : i32
    %c0_i32_0 = arith.constant 0 : i32
    %c0_i32_1 = arith.constant 0 : i32
    return %c0_i32, %c0_i32_0 : i32, i32
  }
  func.func @transform_6(%arg0: i32) -> (i32, i32) {
    %c0_i32 = arith.constant 0 : i32
    %c0_i32_0 = arith.constant 0 : i32
    %c0_i32_1 = arith.constant 0 : i32
    return %c0_i32, %c0_i32_0 : i32, i32
  }
  func.func @transform_7(%arg0: i32) -> (i32, i32) {
    %c0_i32 = arith.constant 0 : i32
    %c0_i32_0 = arith.constant 0 : i32
    return %arg0, %c0_i32 : i32, i32
  }
}

</mosaic_0001>

<bundles_post_ra>
// kernel: mlp_forward.1
= control target key start
LH: loop header
LB: loop body
LE: loop exit
PB: predicated region body
PF: predicated region fallthrough
CT: control target
= control target key end

     0   :  { %12 = vsyncpa [#allocation3], 0  ;;  %s4653_s0 = inlined_call_operand.vmem [shape: f32[32,784], index: 0, kind: input, shape index: {}]   ;;  %s4654_s1 = inlined_call_operand.hbm [shape: bf16[784,512], index: 1, kind: input, shape index: {}]   ;;  %s4655_s2 = inlined_call_operand.vmem [shape: f32[1,512], index: 2, kind: input, shape index: {}]   ;;  %s4656_s3 = inlined_call_operand.hbm [shape: bf16[512,512], index: 3, kind: input, shape index: {}]   ;;  %s4657_s4 = inlined_call_operand.vmem [shape: f32[1,512], index: 4, kind: input, shape index: {}]   ;;  %s4658_s5 = inlined_call_operand.vmem [shape: bf16[512,128], index: 5, kind: input, shape index: {}]   ;;  %s4659_s6 = inlined_call_operand.vmem [shape: f32[1,128], index: 6, kind: input, shape index: {}]   ;;  %s4660_s7 = inlined_call_operand.vmem [shape: bf16[32,128], index: 7, kind: output, shape index: {}]  }
   0x1   :  { %13 = vsyncpa [#allocation5], 0  ;;  %s4395_s24 = smov 0  }
   0x2 LB: > { %s3304_s25 = sadd.s32 4294967295, %s4348_s24   ;;  %p3306_p0 = scmp.ge.s32.totalorder %s4348_s24, 1  ;;  %s4348_s24 = sphi %s4395_s24, %s19_s24  }
   0x3   : > { %p202_p1 = scmp.lt.s32.totalorder %s4348_s24, 3  ;;  %s4350_s26 = smov [#allocation2]  }
   0x4   : > { %s214_s27 = sshll.u32 %s4350_s26, 4  ;;  %p4409_p3 = scmp.eq.s32.totalorder %s3304_s25, 0  ;;  %s215_s27 = int_to_ptr.vmem [resolvable:$true] %s214_s27 }
   0x5   : > { %p4403_p2 = pnand %p3306_p0, %p202_p1  ;;  %s4351_s30 = smov [#allocation4]  }
   0x6   : > { %s230_s8 = sshll.u32 %s4351_s30, 4  ;;  %s4293_s10 = scalar_lea.vmem %s215_s27, 25088  ;;  %s231_s8 = int_to_ptr.vmem [resolvable:$true] %s230_s8 }
   0x7   : > { %p3740_p4 = pneg %p4403_p2  ;;  %p4294_p7 = scmp.ne.s32.totalorder %s215_s27, %s4293_s10 }
   0x8   : > { %p4301_p10 = scmp.lt.s32.totalorder %s215_s27, %s215_s27  ;;  %p4302_p11 = scmp.lt.s32.totalorder %s4293_s10, %s4293_s10 }
   0x9   : > { %p4417_p5 = pnand %p4409_p3, %p3740_p4 }
   0xa   : > { %p4303_p12 = por %p4302_p11, %p4301_p10 }
   0xb   : > { %p4284_p6 = pneg %p4417_p5 }
   0xd   : > { %p4296_p8 = pnand %p4294_p7, %p4284_p6 }
   0xf   : > { %p4297_p9 = pneg %p4296_p8 }
  0x11   : > { %p4304_p13 = pnand %p4303_p12, %p4297_p9 }
  0x13   : > { %4307 = shalt.err (!%p4304_p13)
}
  0x14   : > { %s4352_s11 = smov 256   ;;  %s4353_s12 = smov 16  }
  0x15   : > { %3743 = dma.hbm_to_vmem [thread:$0]  (!%p4417_p5), %s4654_s1, 25088, %s215_s27, [#allocation3], %s4352_s11, %s4352_s11, %s4353_s12  }
  0x16   : > { %s4319_s15 = scalar_lea.vmem %s231_s8, 16384  ;;  %p4327_p7 = scmp.lt.s32.totalorder %s231_s8, %s231_s8 }
  0x17   : > { %p4320_p0 = scmp.ne.s32.totalorder %s231_s8, %s4319_s15  ;;  %p4328_p8 = scmp.lt.s32.totalorder %s4319_s15, %s4319_s15 }
  0x19   : > { %p4322_p1 = pnand %p4320_p0, %p4284_p6  ;;  %p4329_p10 = por %p4328_p8, %p4327_p7 }
  0x1b   : > { %p4323_p4 = pneg %p4322_p1 }
  0x1d   : > { %p4330_p9 = pnand %p4329_p10, %p4323_p4 }
  0x1f   : > { %4333 = shalt.err (!%p4330_p9)
}
  0x20   : > { %3746 = dma.hbm_to_vmem [thread:$0]  (!%p4417_p5), %s4656_s3, 16384, %s231_s8, [#allocation5], %s4352_s11, %s4352_s11, %s4353_s12  }
  0x21   : > { %265 = sbr.rel (%p4403_p2) target bundleno = 929 (0x3a1), region = 48 }
  0x26   : > { %4339 = dma.done.wait (%p4409_p3), [#allocation3], 25088  }
  0x27   : > { %4341 = vsyncadd (%p4409_p3), [#allocation3], 4294942208 }
  0x28   : > { %4343 = dma.done.wait (%p4409_p3), [#allocation5], 16384  }
  0x29   : > { %4345 = vsyncadd (%p4409_p3), [#allocation5], 4294950912  ;;  %v3764_v0 = vld [vmem:[#allocation2 + $0xe4] ss:$16 sps:$4 sm:$0xff]   ;;  %v3768_v2 = vld [vmem:[#allocation2 + $0xe0] ss:$16 sps:$4 sm:$0xff]  }
  0x2a   : > { %v3766_v1 = vld [vmem:[#allocation2 + $0x2e4] ss:$16 sps:$4 sm:$0xff]   ;;  %1539 = vmatprep.subr.bf16.mxu0 %v3764_v0  ;;  %v3769_v3 = vld [vmem:[#allocation2 + $0x2e0] ss:$16 sps:$4 sm:$0xff]   ;;  %s3313_s18 = sshll.u32 %s3304_s25, 1  ;;  %vm1535_vm0 = vcmask 130048  }
  0x2b   : > { %1582 = vmatprep.subr.bf16.mxu1 %v3766_v1  ;;  %v3770_v4 = vld [vmem:[#allocation2 + $0xc4] ss:$16 sps:$4 sm:$0xff]   ;;  %1540 = vmatpush1.bf16.msra.mxu0 %v3768_v2  ;;  %v3774_v6 = vld [vmem:[#allocation2 + $0xc0] ss:$16 sps:$4 sm:$0xff]   ;;  %p303_p2 = scmp.lt.s32.totalorder %s3313_s18, 3 }
  0x2c   : > { %1583 = vmatpush1.bf16.msra.mxu1 %v3769_v3  ;;  %v3772_v5 = vld [vmem:[#allocation2 + $0x2c4] ss:$16 sps:$4 sm:$0xff]   ;;  %1541 = vmatprep.subr.bf16.mxu0 %v3770_v4  ;;  %v3775_v7 = vld [vmem:[#allocation2 + $0x2c0] ss:$16 sps:$4 sm:$0xff]  }
  0x2d   : > { %1584 = vmatprep.subr.bf16.mxu1 %v3772_v5  ;;  %v3776_v8 = vld [vmem:[#allocation2 + $0xa4] ss:$16 sps:$4 sm:$0xff]   ;;  %v3780_v10 = vld [vmem:[#allocation2 + $0xa0] ss:$16 sps:$4 sm:$0xff]   ;;  %s4665_s18 = smov (!%p303_p2, %s3313_s18), 3 }
  0x2e   : > { %v3778_v9 = vld [vmem:[#allocation2 + $0x2a4] ss:$16 sps:$4 sm:$0xff]   ;;  %v3781_v11 = vld [vmem:[#allocation2 + $0x2a0] ss:$16 sps:$4 sm:$0xff]   ;;  %s3731_s19 = smul.u32 56, %s4665_s18  ;;  %s3316_s8 = sshll.u32 %s4665_s18, 2 }
  0x2f   : > { %1542 = vmatpush1.bf16.msra.mxu0 %v3774_v6  ;;  %v3782_v12 = vld [vmem:[#allocation2 + $0x84] ss:$16 sps:$4 sm:$0xff]   ;;  %v3786_v14 = vld [vmem:[#allocation2 + $0x80] ss:$16 sps:$4 sm:$0xff]   ;;  %s313_s11 = scalar_lea.vmem %s4660_s7, %s3316_s8 }
  0x30   : > { %1585 = vmatpush1.bf16.msra.mxu1 %v3775_v7  ;;  %1543 = vmatprep.subr.bf16.mxu0 %v3776_v8  ;;  %v3784_v13 = vld [vmem:[#allocation2 + $0x284] ss:$16 sps:$4 sm:$0xff]   ;;  %v3787_v15 = vld [vmem:[#allocation2 + $0x280] ss:$16 sps:$4 sm:$0xff]   ;;  %s4457_s22 = scalar_lea.vmem %s4653_s0, %s3731_s19 }
  0x31   : > { %1586 = vmatprep.subr.bf16.mxu1 %v3778_v9  ;;  %v3788_v16 = vld [vmem:[#allocation2 + $0x64] ss:$16 sps:$4 sm:$0xff]   ;;  %v3792_v18 = vld [vmem:[#allocation2 + $0x60] ss:$16 sps:$4 sm:$0xff]   ;;  %v317_v46 = vld [vmem:[%s4457_s22 + $0x8] sm:$0xff] }
  0x32   : > { %v3790_v17 = vld [vmem:[#allocation2 + $0x264] ss:$16 sps:$4 sm:$0xff]   ;;  %v3793_v19 = vld [vmem:[#allocation2 + $0x260] ss:$16 sps:$4 sm:$0xff]   ;;  %v319_v48 = vld [vmem:[%s4457_s22 + $0x18] sm:$0xff] }
  0x33   : > { %1544 = vmatpush1.bf16.msra.mxu0 %v3780_v10  ;;  %v3794_v20 = vld [vmem:[#allocation2 + $0x44] ss:$16 sps:$4 sm:$0xff]   ;;  %v3798_v22 = vld [vmem:[#allocation2 + $0x40] ss:$16 sps:$4 sm:$0xff]   ;;  %v323_v7 = vld [vmem:[%s4457_s22 + $0x38] sm:$0xff] }
  0x34   : > { %1587 = vmatpush1.bf16.msra.mxu1 %v3781_v11  ;;  %1545 = vmatprep.subr.bf16.mxu0 %v3782_v12  ;;  %v3796_v21 = vld [vmem:[#allocation2 + $0x244] ss:$16 sps:$4 sm:$0xff]   ;;  %v3799_v23 = vld [vmem:[#allocation2 + $0x240] ss:$16 sps:$4 sm:$0xff]   ;;  %v325_v9 = vld [vmem:[%s4457_s22 + $0x48] sm:$0xff] }
  0x35   : > { %1588 = vmatprep.subr.bf16.mxu1 %v3784_v13  ;;  %v3800_v24 = vld [vmem:[#allocation2 + $0x24] ss:$16 sps:$4 sm:$0xff]   ;;  %v3804_v26 = vld [vmem:[#allocation2 + $0x20] ss:$16 sps:$4 sm:$0xff]  }
  0x36   : > { %v3802_v25 = vld [vmem:[#allocation2 + $0x224] ss:$16 sps:$4 sm:$0xff]   ;;  %v3805_v27 = vld [vmem:[#allocation2 + $0x220] ss:$16 sps:$4 sm:$0xff]  }
  0x37   : > { %1546 = vmatpush1.bf16.msra.mxu0 %v3786_v14  ;;  %v3806_v28 = vld [vmem:[#allocation2 + $0x4] ss:$16 sps:$4 sm:$0xff]   ;;  %v3810_v30 = vld [vmem:[#allocation2] ss:$16 sps:$4 sm:$0xff]  }
  0x38   : > { %1589 = vmatpush1.bf16.msra.mxu1 %v3787_v15  ;;  %1547 = vmatprep.subr.bf16.mxu0 %v3788_v16  ;;  %v3808_v29 = vld [vmem:[#allocation2 + $0x204] ss:$16 sps:$4 sm:$0xff]   ;;  %v3811_v31 = vld [vmem:[#allocation2 + $0x200] ss:$16 sps:$4 sm:$0xff]  }
  0x39   : > { %1590 = vmatprep.subr.bf16.mxu1 %v3790_v17  ;;  %v3812_v32 = vld [vmem:[#allocation2 + $0x1e4] ss:$16 sps:$4 sm:$0xff]   ;;  %v3816_v34 = vld [vmem:[#allocation2 + $0x1e0] ss:$16 sps:$4 sm:$0xff]   ;;  %v3871_v17 = vld [vmem:[#allocation2 + $0xec] ss:$16 sps:$4 sm:$0xff]  }
  0x3a   : > { %v3814_v33 = vld [vmem:[#allocation2 + $0x3e4] ss:$16 sps:$4 sm:$0xff]   ;;  %v3817_v35 = vld [vmem:[#allocation2 + $0x3e0] ss:$16 sps:$4 sm:$0xff]  }
  0x3b   : > { %1548 = vmatpush1.bf16.msra.mxu0 %v3792_v18  ;;  %v3818_v36 = vld [vmem:[#allocation2 + $0x1c4] ss:$16 sps:$4 sm:$0xff]   ;;  %v3822_v38 = vld [vmem:[#allocation2 + $0x1c0] ss:$16 sps:$4 sm:$0xff]  }
  0x3c   : > { %1591 = vmatpush1.bf16.msra.mxu1 %v3793_v19  ;;  %1549 = vmatprep.subr.bf16.mxu0 %v3794_v20  ;;  %v3820_v37 = vld [vmem:[#allocation2 + $0x3c4] ss:$16 sps:$4 sm:$0xff]   ;;  %v3823_v39 = vld [vmem:[#allocation2 + $0x3c0] ss:$16 sps:$4 sm:$0xff]   ;;  %v329_v20 = vld [vmem:[%s4457_s22 + $0x68] sm:$0xff] }
  0x3d   : > { %1592 = vmatprep.subr.bf16.mxu1 %v3796_v21  ;;  %v3824_v40 = vld [vmem:[#allocation2 + $0x1a4] ss:$16 sps:$4 sm:$0xff]   ;;  %v3828_v42 = vld [vmem:[#allocation2 + $0x1a0] ss:$16 sps:$4 sm:$0xff]   ;;  %v4354_v21 = vmov 0  }
  0x3e   : > { %v3826_v41 = vld [vmem:[#allocation2 + $0x3a4] ss:$16 sps:$4 sm:$0xff]   ;;  %v3829_v43 = vld [vmem:[#allocation2 + $0x3a0] ss:$16 sps:$4 sm:$0xff]  }
  0x3f   : > { %1550 = vmatpush1.bf16.msra.mxu0 %v3798_v22  ;;  %v3830_v44 = vld [vmem:[#allocation2 + $0x184] ss:$16 sps:$4 sm:$0xff]   ;;  %v3834_v50 = vld [vmem:[#allocation2 + $0x180] ss:$16 sps:$4 sm:$0xff]  }
  0x40   : > { %1593 = vmatpush1.bf16.msra.mxu1 %v3799_v23  ;;  %1551 = vmatprep.subr.bf16.mxu0 %v3800_v24  ;;  %v3832_v45 = vld [vmem:[#allocation2 + $0x384] ss:$16 sps:$4 sm:$0xff]   ;;  %v3835_v51 = vld [vmem:[#allocation2 + $0x380] ss:$16 sps:$4 sm:$0xff]   ;;  %v3869_v24 = vld [vmem:[#allocation2 + $0xe8] ss:$16 sps:$4 sm:$0xff]  }
  0x41   : > { %1594 = vmatprep.subr.bf16.mxu1 %v3802_v25  ;;  %v324_v47 = vld [vmem:[%s4457_s22 + $0x40] sm:$0xff]  ;;  %v326_v49 = vld [vmem:[%s4457_s22 + $0x50] sm:$0xff] }
  0x42   : > { %v3836_v52 = vld [vmem:[#allocation2 + $0x164] ss:$16 sps:$4 sm:$0xff]   ;;  %v4463_v53 = vpack.c.bf16 %v324_v47, %v317_v46  ;;  %v4465_v54 = vpack.c.bf16 %v326_v49, %v319_v48  ;;  %v3840_v56 = vld [vmem:[#allocation2 + $0x160] ss:$16 sps:$4 sm:$0xff]   ;;  %v3899_v47 = vld [vmem:[#allocation2 + $0x48] ss:$16 sps:$4 sm:$0xff]  }
  0x43   : > { %1552 = vmatpush1.bf16.msra.mxu0 %v3804_v26  ;;  %v3838_v55 = vld [vmem:[#allocation2 + $0x364] ss:$16 sps:$4 sm:$0xff]   ;;  %v3841_v57 = vld [vmem:[#allocation2 + $0x360] ss:$16 sps:$4 sm:$0xff]   ;;  %v3877_v26 = vld [vmem:[#allocation2 + $0xcc] ss:$16 sps:$4 sm:$0xff]  }
  0x44   : > { %1595 = vmatpush1.bf16.msra.mxu1 %v3805_v27  ;;  %1553 = vmatprep.subr.bf16.mxu0 %v3806_v28  ;;  %v3842_v58 = vld [vmem:[#allocation2 + $0x144] ss:$16 sps:$4 sm:$0xff]   ;;  %v3846_v60 = vld [vmem:[#allocation2 + $0x140] ss:$16 sps:$4 sm:$0xff]   ;;  %v3875_v28 = vld [vmem:[#allocation2 + $0xc8] ss:$16 sps:$4 sm:$0xff]  }
  0x45   : > { %1596 = vmatprep.subr.bf16.mxu1 %v3808_v29  ;;  %1571 = vmatprep.mubr.bf16.mxu0 %v4463_v53  ;;  %v3844_v59 = vld [vmem:[#allocation2 + $0x344] ss:$16 sps:$4 sm:$0xff]   ;;  %v3847_v61 = vld [vmem:[#allocation2 + $0x340] ss:$16 sps:$4 sm:$0xff]   ;;  %v3907_v49 = vld [vmem:[#allocation2 + $0x2c] ss:$16 sps:$4 sm:$0xff]  }
  0x46   : > { %1614 = vmatprep.mubr.bf16.mxu1 %v4465_v54  ;;  %v3848_v62 = vld [vmem:[#allocation2 + $0x124] ss:$16 sps:$4 sm:$0xff]   ;;  %v3852_v0 = vld [vmem:[#allocation2 + $0x120] ss:$16 sps:$4 sm:$0xff]  }
  0x47   : > { %1554 = vmatpush1.bf16.msra.mxu0 %v3810_v30  ;;  %v3850_v63 = vld [vmem:[#allocation2 + $0x324] ss:$16 sps:$4 sm:$0xff]   ;;  %v3853_v1 = vld [vmem:[#allocation2 + $0x320] ss:$16 sps:$4 sm:$0xff]   ;;  %v3883_v30 = vld [vmem:[#allocation2 + $0xac] ss:$16 sps:$4 sm:$0xff]  }
  0x48   : > { %1597 = vmatpush1.bf16.msra.mxu1 %v3811_v31  ;;  %1555 = vmatprep.subr.bf16.mxu0 %v3812_v32  ;;  %v3854_v2 = vld [vmem:[#allocation2 + $0x104] ss:$16 sps:$4 sm:$0xff]   ;;  %v3858_v4 = vld [vmem:[#allocation2 + $0x100] ss:$16 sps:$4 sm:$0xff]   ;;  %v3881_v32 = vld [vmem:[#allocation2 + $0xa8] ss:$16 sps:$4 sm:$0xff]  }
  0x49   : > { %1598 = vmatprep.subr.bf16.mxu1 %v3814_v33  ;;  %v3856_v3 = vld [vmem:[#allocation2 + $0x304] ss:$16 sps:$4 sm:$0xff]   ;;  %v3859_v5 = vld [vmem:[#allocation2 + $0x300] ss:$16 sps:$4 sm:$0xff]  }
  0x4a   : > { %v316_v6 = vld [vmem:[%s4457_s22] sm:$0xff]  ;;  %v318_v8 = vld [vmem:[%s4457_s22 + $0x10] sm:$0xff] }
  0x4b   : > { %1556 = vmatpush2.bf16.msra.mxu0 %v3816_v34  ;;  %v3862_v10 = vld [vmem:[#allocation2 + $0x4e4] ss:$16 sps:$4 sm:$0xff]   ;;  %v4473_v12 = vpack.c.bf16 %v323_v7, %v316_v6  ;;  %v4475_v13 = vpack.c.bf16 %v325_v9, %v318_v8  ;;  %v3860_v14 = vld [vmem:[#allocation2 + $0x4e0] ss:$16 sps:$4 sm:$0xff]   ;;  %v3889_v34 = vld [vmem:[#allocation2 + $0x8c] ss:$16 sps:$4 sm:$0xff]  }
  0x4c   : > { %1599 = vmatpush2.bf16.msra.mxu1 %v3817_v35  ;;  %1557 = vmatprep.subr.bf16.mxu0 %v3818_v36  ;;  %v3865_v11 = vld [vmem:[#allocation2 + $0x604] ss:$16 sps:$4 sm:$0xff]   ;;  %v3863_v15 = vld [vmem:[#allocation2 + $0x600] ss:$16 sps:$4 sm:$0xff]   ;;  %v3887_v36 = vld [vmem:[#allocation2 + $0x88] ss:$16 sps:$4 sm:$0xff]  }
  0x4d   : > { %1600 = vmatprep.subr.bf16.mxu1 %v3820_v37  ;;  %v3868_v16 = vld [vmem:[#allocation2 + $0x4c4] ss:$16 sps:$4 sm:$0xff]   ;;  %v3866_v18 = vld [vmem:[#allocation2 + $0x4c0] ss:$16 sps:$4 sm:$0xff]   ;;  %v3937_v6 = vld [vmem:[#allocation2 + $0x18c] ss:$16 sps:$4 sm:$0xff]  }
  0x4e   : > { %v322_v19 = vld [vmem:[%s4457_s22 + $0x30] sm:$0xff]  ;;  %v3935_v8 = vld [vmem:[#allocation2 + $0x188] ss:$16 sps:$4 sm:$0xff]  }
  0x4f   : > { %1558 = vmatpush2.bf16.msra.mxu0 %v3822_v38  ;;  %v3874_v22 = vld [vmem:[#allocation2 + $0x4a4] ss:$16 sps:$4 sm:$0xff]   ;;  %v4482_v23 = vpack.c.bf16 %v329_v20, %v322_v19  ;;  %v3872_v25 = vld [vmem:[#allocation2 + $0x4a0] ss:$16 sps:$4 sm:$0xff]   ;;  %v3895_v38 = vld [vmem:[#allocation2 + $0x6c] ss:$16 sps:$4 sm:$0xff]  }
  0x50   : > { %1601 = vmatpush2.bf16.msra.mxu1 %v3823_v39  ;;  %1559 = vmatprep.subr.bf16.mxu0 %v3824_v40  ;;  %v3880_v27 = vld [vmem:[#allocation2 + $0x484] ss:$16 sps:$4 sm:$0xff]   ;;  %v3878_v29 = vld [vmem:[#allocation2 + $0x480] ss:$16 sps:$4 sm:$0xff]   ;;  %v3893_v40 = vld [vmem:[#allocation2 + $0x68] ss:$16 sps:$4 sm:$0xff]  }
  0x51   : > { %1602 = vmatprep.subr.bf16.mxu1 %v3826_v41  ;;  %v3886_v31 = vld [vmem:[#allocation2 + $0x464] ss:$16 sps:$4 sm:$0xff]   ;;  %v3884_v33 = vld [vmem:[#allocation2 + $0x460] ss:$16 sps:$4 sm:$0xff]   ;;  %v321_v41 = vld [vmem:[%s4457_s22 + $0x28] sm:$0xff] }
  0x52   : > { %v3892_v35 = vld [vmem:[#allocation2 + $0x444] ss:$16 sps:$4 sm:$0xff]   ;;  %v3890_v37 = vld [vmem:[#allocation2 + $0x440] ss:$16 sps:$4 sm:$0xff]  }
  0x53   : > { %1560 = vmatpush2.bf16.msra.mxu0 %v3828_v42  ;;  %v3898_v39 = vld [vmem:[#allocation2 + $0x424] ss:$16 sps:$4 sm:$0xff]   ;;  %v3902_v48 = vld [vmem:[#allocation2 + $0x400] ss:$16 sps:$4 sm:$0xff]  }
  0x54   : > { %1603 = vmatpush2.bf16.msra.mxu1 %v3829_v43  ;;  %1561 = vmatprep.subr.bf16.mxu0 %v3830_v44  ;;  %v328_v42 = vld [vmem:[%s4457_s22 + $0x60] sm:$0xff] }
  0x55   : > { %1604 = vmatprep.subr.bf16.mxu1 %v3832_v45  ;;  %v3896_v43 = vld [vmem:[#allocation2 + $0x420] ss:$16 sps:$4 sm:$0xff]   ;;  %v4489_v44 = vpack.c.bf16 %v328_v42, %v321_v41  ;;  %v3901_v45 = vld [vmem:[#allocation2 + $0x4c] ss:$16 sps:$4 sm:$0xff]   ;;  %v3904_v46 = vld [vmem:[#allocation2 + $0x404] ss:$16 sps:$4 sm:$0xff]  }
  0x56   : > { %v3940_v7 = vld [vmem:[#allocation2 + $0x544] ss:$16 sps:$4 sm:$0xff]   ;;  %v3938_v9 = vld [vmem:[#allocation2 + $0x540] ss:$16 sps:$4 sm:$0xff]   ;;  %v3979_v41 = vld [vmem:[#allocation2 + $0x4ac] ss:$16 sps:$4 sm:$0xff]  }
  0x57   : > { %1562 = vmatpush2.bf16.msra.mxu0 %v3834_v50  ;;  %v3910_v50 = vld [vmem:[#allocation2 + $0x5e4] ss:$16 sps:$4 sm:$0xff]   ;;  %v3950_v19 = vld [vmem:[#allocation2 + $0x500] ss:$16 sps:$4 sm:$0xff]   ;;  %v3982_v42 = vld [vmem:[#allocation2 + $0x26c] ss:$16 sps:$4 sm:$0xff]  }
  0x58   : > { %1605 = vmatpush2.bf16.msra.mxu1 %v3835_v51  ;;  %1563 = vmatprep.subr.bf16.mxu0 %v3836_v52  ;;  %v3905_v51 = vld [vmem:[#allocation2 + $0x28] ss:$16 sps:$4 sm:$0xff]   ;;  %v3908_v52 = vld [vmem:[#allocation2 + $0x5e0] ss:$16 sps:$4 sm:$0xff]  }
  0x59   : > { %1606 = vmatprep.subr.bf16.mxu1 %v3838_v55  ;;  %v3916_v55 = vld [vmem:[#allocation2 + $0x5c4] ss:$16 sps:$4 sm:$0xff]  }
  0x5a   : > { %v320_v20 = vld [vmem:[%s4457_s22 + $0x20] sm:$0xff] }
  0x5b   : > { %1564 = vmatpush2.bf16.msra.mxu0 %v3840_v56  ;;  %v3911_v56 = vld [vmem:[#allocation2 + $0x8] ss:$16 sps:$4 sm:$0xff]  }
  0x5c   : > { %1607 = vmatpush2.bf16.msra.mxu1 %v3841_v57  ;;  %1565 = vmatprep.subr.bf16.mxu0 %v3842_v58  ;;  %v3914_v57 = vld [vmem:[#allocation2 + $0x5c0] ss:$16 sps:$4 sm:$0xff]   ;;  %v3919_v58 = vld [vmem:[#allocation2 + $0x1ec] ss:$16 sps:$4 sm:$0xff]  }
  0x5d   : > { %1608 = vmatprep.subr.bf16.mxu1 %v3844_v59  ;;  %v3922_v59 = vld [vmem:[#allocation2 + $0x5a4] ss:$16 sps:$4 sm:$0xff]  }
  0x5f   : > { %1566 = vmatpush2.bf16.msra.mxu0 %v3846_v60  ;;  %v3917_v60 = vld [vmem:[#allocation2 + $0x1e8] ss:$16 sps:$4 sm:$0xff]  }
  0x60   : > { %1609 = vmatpush2.bf16.msra.mxu1 %v3847_v61  ;;  %1567 = vmatprep.subr.bf16.mxu0 %v3848_v62  ;;  %v3920_v61 = vld [vmem:[#allocation2 + $0x5a0] ss:$16 sps:$4 sm:$0xff]   ;;  %v3925_v62 = vld [vmem:[#allocation2 + $0x1cc] ss:$16 sps:$4 sm:$0xff]  }
  0x61   : > { %1610 = vmatprep.subr.bf16.mxu1 %v3850_v63  ;;  %v3928_v63 = vld [vmem:[#allocation2 + $0x584] ss:$16 sps:$4 sm:$0xff]  }
  0x63   : > { %1568 = vmatpush2.bf16.msra.mxu0 %v3852_v0  ;;  %v3923_v0 = vld [vmem:[#allocation2 + $0x1c8] ss:$16 sps:$4 sm:$0xff]  }
  0x64   : > { %1611 = vmatpush2.bf16.msra.mxu1 %v3853_v1  ;;  %1569 = vmatprep.subr.bf16.mxu0 %v3854_v2  ;;  %v3926_v1 = vld [vmem:[#allocation2 + $0x580] ss:$16 sps:$4 sm:$0xff]   ;;  %v3931_v2 = vld [vmem:[#allocation2 + $0x1ac] ss:$16 sps:$4 sm:$0xff]  }
  0x65   : > { %1612 = vmatprep.subr.bf16.mxu1 %v3856_v3  ;;  %v3934_v3 = vld [vmem:[#allocation2 + $0x564] ss:$16 sps:$4 sm:$0xff]  }
  0x67   : > { %1570 = vmatpush2.bf16.msra.mxu0 %v3858_v4  ;;  %v3929_v4 = vld [vmem:[#allocation2 + $0x1a8] ss:$16 sps:$4 sm:$0xff]  }
  0x68   : > { %1613 = vmatpush2.bf16.msra.mxu1 %v3859_v5  ;;  %1625 = vmatprep.subr.bf16.mxu0 %v3862_v10  ;;  %v3932_v5 = vld [vmem:[#allocation2 + $0x560] ss:$16 sps:$4 sm:$0xff]   ;;  %v3943_v10 = vld [vmem:[#allocation2 + $0x16c] ss:$16 sps:$4 sm:$0xff]  }
  0x69   : > { %1682 = vmatprep.subr.bf16.mxu1 %v3865_v11  ;;  %v3946_v11 = vld [vmem:[#allocation2 + $0x524] ss:$16 sps:$4 sm:$0xff]  }
  0x6a   : > { %1572 = vmatmul.mubr.bf16.vlgmr.msra.gmra.mxu0 %v4473_v12 }
  0x6b   : > { %1615 = vmatmul.mubr.bf16.vlgmr.msra.gmra.mxu1 %v4475_v13  ;;  %1626 = vmatpush1.bf16.msra.mxu0 %v3860_v14  ;;  %v3941_v14 = vld [vmem:[#allocation2 + $0x168] ss:$16 sps:$4 sm:$0xff]  }
  0x6c   : > { %1683 = vmatpush1.bf16.msra.mxu1 %v3863_v15  ;;  %1627 = vmatprep.subr.bf16.mxu0 %v3868_v16  ;;  %v3944_v15 = vld [vmem:[#allocation2 + $0x520] ss:$16 sps:$4 sm:$0xff]   ;;  %v3949_v16 = vld [vmem:[#allocation2 + $0x14c] ss:$16 sps:$4 sm:$0xff]  }
  0x6d   : > { %1700 = vmatprep.mubr.bf16.mxu1 %v4354_v21  ;;  %1711 = vmatprep.subr.bf16.mxu1 %v3871_v17  ;;  %v3952_v17 = vld [vmem:[#allocation2 + $0x504] ss:$16 sps:$4 sm:$0xff]  }
  0x6e   : > { %1657 = vmatprep.mubr.bf16.mxu0 %v4489_v44 }
  0x6f   : > { %1628 = vmatpush1.bf16.msra.mxu0 %v3866_v18  ;;  %v3947_v18 = vld [vmem:[#allocation2 + $0x148] ss:$16 sps:$4 sm:$0xff]  }
  0x70   : > { %1629 = vmatprep.subr.bf16.mxu0 %v3874_v22  ;;  %v327_v22 = vld [vmem:[%s4457_s22 + $0x58] sm:$0xff] }
  0x73   : > { %3513 = vmatmul.mubr.msk.bf16.vlgmr.msra.gmra.mxu1 %vm1535_vm0, %v4482_v23  ;;  %1630 = vmatpush1.bf16.msra.mxu0 %v3872_v25  ;;  %v3958_v25 = vld [vmem:[#allocation2 + $0x2ec] ss:$16 sps:$4 sm:$0xff]  }
  0x74   : > { %1712 = vmatpush1.bf16.msra.mxu1 %v3869_v24  ;;  %1631 = vmatprep.subr.bf16.mxu0 %v3880_v27  ;;  %v3955_v24 = vld [vmem:[#allocation2 + $0x12c] ss:$16 sps:$4 sm:$0xff]   ;;  %v3953_v27 = vld [vmem:[#allocation2 + $0x128] ss:$16 sps:$4 sm:$0xff]  }
  0x75   : > { %1713 = vmatprep.subr.bf16.mxu1 %v3877_v26  ;;  %1743 = vmatprep.mubr.bf16.mxu1 %v4463_v53  ;;  %v3913_v53 = vld [vmem:[#allocation2 + $0xc] ss:$16 sps:$4 sm:$0xff]   ;;  %v4494_v26 = vpack.c.bf16 %v327_v22, %v320_v20  ;;  %v4037_v20 = vld [vmem:[#allocation2 + $0x568] ss:$16 sps:$4 sm:$0xff]  }
  0x76   : > { %v4040_v22 = vld [vmem:[#allocation2 + $0x328] ss:$16 sps:$4 sm:$0xff]  }
  0x77   : > { %1632 = vmatpush1.bf16.msra.mxu0 %v3878_v29  ;;  %v3961_v29 = vld [vmem:[#allocation2 + $0x10c] ss:$16 sps:$4 sm:$0xff]  }
  0x78   : > { %1714 = vmatpush1.bf16.msra.mxu1 %v3875_v28  ;;  %1633 = vmatprep.subr.bf16.mxu0 %v3886_v31  ;;  %v3956_v28 = vld [vmem:[#allocation2 + $0x2e8] ss:$16 sps:$4 sm:$0xff]  }
  0x79   : > { %1715 = vmatprep.subr.bf16.mxu1 %v3883_v30  ;;  %v3964_v30 = vld [vmem:[#allocation2 + $0x2cc] ss:$16 sps:$4 sm:$0xff]   ;;  %v3959_v31 = vld [vmem:[#allocation2 + $0x108] ss:$16 sps:$4 sm:$0xff]  }
  0x7b   : > { %1634 = vmatpush1.bf16.msra.mxu0 %v3884_v33  ;;  %v3967_v33 = vld [vmem:[#allocation2 + $0x4ec] ss:$16 sps:$4 sm:$0xff]  }
  0x7c   : > { %1716 = vmatpush1.bf16.msra.mxu1 %v3881_v32  ;;  %1635 = vmatprep.subr.bf16.mxu0 %v3892_v35  ;;  %v3962_v32 = vld [vmem:[#allocation2 + $0x2c8] ss:$16 sps:$4 sm:$0xff]  }
  0x7d   : > { %1717 = vmatprep.subr.bf16.mxu1 %v3889_v34  ;;  %v3970_v34 = vld [vmem:[#allocation2 + $0x2ac] ss:$16 sps:$4 sm:$0xff]   ;;  %v3965_v35 = vld [vmem:[#allocation2 + $0x4e8] ss:$16 sps:$4 sm:$0xff]  }
  0x7f   : > { %1636 = vmatpush1.bf16.msra.mxu0 %v3890_v37  ;;  %v3973_v37 = vld [vmem:[#allocation2 + $0x4cc] ss:$16 sps:$4 sm:$0xff]  }
  0x80   : > { %1718 = vmatpush1.bf16.msra.mxu1 %v3887_v36  ;;  %1637 = vmatprep.subr.bf16.mxu0 %v3898_v39  ;;  %v3968_v36 = vld [vmem:[#allocation2 + $0x2a8] ss:$16 sps:$4 sm:$0xff]  }
  0x81   : > { %1719 = vmatprep.subr.bf16.mxu1 %v3895_v38  ;;  %v3976_v38 = vld [vmem:[#allocation2 + $0x28c] ss:$16 sps:$4 sm:$0xff]   ;;  %v3971_v39 = vld [vmem:[#allocation2 + $0x4c8] ss:$16 sps:$4 sm:$0xff]  }
  0x83   : > { %1638 = vmatpush1.bf16.msra.mxu0 %v3896_v43  ;;  %v3977_v43 = vld [vmem:[#allocation2 + $0x4a8] ss:$16 sps:$4 sm:$0xff]  }
  0x84   : > { %1720 = vmatpush1.bf16.msra.mxu1 %v3893_v40  ;;  %1639 = vmatprep.subr.bf16.mxu0 %v3904_v46  ;;  %v3974_v40 = vld [vmem:[#allocation2 + $0x288] ss:$16 sps:$4 sm:$0xff]   ;;  %v3988_v46 = vld [vmem:[#allocation2 + $0x24c] ss:$16 sps:$4 sm:$0xff]  }
  0x85   : > { %1721 = vmatprep.subr.bf16.mxu1 %v3901_v45  ;;  %v3980_v45 = vld [vmem:[#allocation2 + $0x268] ss:$16 sps:$4 sm:$0xff]  }
  0x87   : > { %1640 = vmatpush1.bf16.msra.mxu0 %v3902_v48  ;;  %v3991_v48 = vld [vmem:[#allocation2 + $0x46c] ss:$16 sps:$4 sm:$0xff]  }
  0x88   : > { %1722 = vmatpush1.bf16.msra.mxu1 %v3899_v47  ;;  %1641 = vmatprep.subr.bf16.mxu0 %v3910_v50  ;;  %v3983_v47 = vld [vmem:[#allocation2 + $0x488] ss:$16 sps:$4 sm:$0xff]  }
  0x89   : > { %1723 = vmatprep.subr.bf16.mxu1 %v3907_v49  ;;  %v3994_v49 = vld [vmem:[#allocation2 + $0x22c] ss:$16 sps:$4 sm:$0xff]   ;;  %v3989_v50 = vld [vmem:[#allocation2 + $0x468] ss:$16 sps:$4 sm:$0xff]  }
  0x8b   : > { %1642 = vmatpush2.bf16.msra.mxu0 %v3908_v52  ;;  %v4000_v52 = vld [vmem:[#allocation2 + $0x20c] ss:$16 sps:$4 sm:$0xff]  }
  0x8c   : > { %1724 = vmatpush1.bf16.msra.mxu1 %v3905_v51  ;;  %1643 = vmatprep.subr.bf16.mxu0 %v3916_v55  ;;  %v3992_v51 = vld [vmem:[#allocation2 + $0x228] ss:$16 sps:$4 sm:$0xff]  }
  0x8d   : > { %1725 = vmatprep.subr.bf16.mxu1 %v3913_v53  ;;  %v3995_v53 = vld [vmem:[#allocation2 + $0x448] ss:$16 sps:$4 sm:$0xff]  }
  0x8e   : > { %v3998_v55 = vld [vmem:[#allocation2 + $0x208] ss:$16 sps:$4 sm:$0xff]  }
  0x8f   : > { %1644 = vmatpush2.bf16.msra.mxu0 %v3914_v57  ;;  %v4006_v57 = vld [vmem:[#allocation2 + $0x3ec] ss:$16 sps:$4 sm:$0xff]  }
  0x90   : > { %1726 = vmatpush1.bf16.msra.mxu1 %v3911_v56  ;;  %1645 = vmatprep.subr.bf16.mxu0 %v3922_v59  ;;  %v4003_v56 = vld [vmem:[#allocation2 + $0x42c] ss:$16 sps:$4 sm:$0xff]   ;;  %v4004_v59 = vld [vmem:[#allocation2 + $0x3e8] ss:$16 sps:$4 sm:$0xff]  }
  0x91   : > { %1727 = vmatprep.subr.bf16.mxu1 %v3919_v58  ;;  %v4001_v58 = vld [vmem:[#allocation2 + $0x428] ss:$16 sps:$4 sm:$0xff]  }
  0x93   : > { %1646 = vmatpush2.bf16.msra.mxu0 %v3920_v61  ;;  %v4012_v61 = vld [vmem:[#allocation2 + $0x3cc] ss:$16 sps:$4 sm:$0xff]  }
  0x94   : > { %1728 = vmatpush2.bf16.msra.mxu1 %v3917_v60  ;;  %1647 = vmatprep.subr.bf16.mxu0 %v3928_v63  ;;  %v4009_v60 = vld [vmem:[#allocation2 + $0x40c] ss:$16 sps:$4 sm:$0xff]   ;;  %v4010_v63 = vld [vmem:[#allocation2 + $0x3c8] ss:$16 sps:$4 sm:$0xff]  }
  0x95   : > { %1729 = vmatprep.subr.bf16.mxu1 %v3925_v62  ;;  %v4007_v62 = vld [vmem:[#allocation2 + $0x408] ss:$16 sps:$4 sm:$0xff]  }
  0x97   : > { %1648 = vmatpush2.bf16.msra.mxu0 %v3926_v1  ;;  %v4018_v1 = vld [vmem:[#allocation2 + $0x3ac] ss:$16 sps:$4 sm:$0xff]  }
  0x98   : > { %1730 = vmatpush2.bf16.msra.mxu1 %v3923_v0  ;;  %1649 = vmatprep.subr.bf16.mxu0 %v3934_v3  ;;  %v4015_v0 = vld [vmem:[#allocation2 + $0x5ec] ss:$16 sps:$4 sm:$0xff]   ;;  %v4016_v3 = vld [vmem:[#allocation2 + $0x3a8] ss:$16 sps:$4 sm:$0xff]  }
  0x99   : > { %1731 = vmatprep.subr.bf16.mxu1 %v3931_v2  ;;  %v4013_v2 = vld [vmem:[#allocation2 + $0x5e8] ss:$16 sps:$4 sm:$0xff]  }
  0x9b   : > { %1650 = vmatpush2.bf16.msra.mxu0 %v3932_v5  ;;  %v4024_v5 = vld [vmem:[#allocation2 + $0x38c] ss:$16 sps:$4 sm:$0xff]  }
  0x9c   : > { %1732 = vmatpush2.bf16.msra.mxu1 %v3929_v4  ;;  %1651 = vmatprep.subr.bf16.mxu0 %v3940_v7  ;;  %v4021_v4 = vld [vmem:[#allocation2 + $0x5cc] ss:$16 sps:$4 sm:$0xff]   ;;  %v4022_v7 = vld [vmem:[#allocation2 + $0x388] ss:$16 sps:$4 sm:$0xff]  }
  0x9d   : > { %1733 = vmatprep.subr.bf16.mxu1 %v3937_v6  ;;  %v4019_v6 = vld [vmem:[#allocation2 + $0x5c8] ss:$16 sps:$4 sm:$0xff]  }
  0x9f   : > { %1652 = vmatpush2.bf16.msra.mxu0 %v3938_v9  ;;  %v4030_v9 = vld [vmem:[#allocation2 + $0x36c] ss:$16 sps:$4 sm:$0xff]  }
  0xa0   : > { %1734 = vmatpush2.bf16.msra.mxu1 %v3935_v8  ;;  %1653 = vmatprep.subr.bf16.mxu0 %v3946_v11  ;;  %v4027_v8 = vld [vmem:[#allocation2 + $0x5ac] ss:$16 sps:$4 sm:$0xff]   ;;  %v4028_v11 = vld [vmem:[#allocation2 + $0x368] ss:$16 sps:$4 sm:$0xff]  }
  0xa1   : > { %1735 = vmatprep.subr.bf16.mxu1 %v3943_v10  ;;  %v4025_v10 = vld [vmem:[#allocation2 + $0x5a8] ss:$16 sps:$4 sm:$0xff]  }
  0xa3   : > { %1654 = vmatpush2.bf16.msra.mxu0 %v3944_v15  ;;  %v4036_v15 = vld [vmem:[#allocation2 + $0x34c] ss:$16 sps:$4 sm:$0xff]  }
  0xa4   : > { %1736 = vmatpush2.bf16.msra.mxu1 %v3941_v14  ;;  %1655 = vmatprep.subr.bf16.mxu0 %v3952_v17  ;;  %v4033_v14 = vld [vmem:[#allocation2 + $0x58c] ss:$16 sps:$4 sm:$0xff]   ;;  %v4034_v17 = vld [vmem:[#allocation2 + $0x348] ss:$16 sps:$4 sm:$0xff]  }
  0xa5   : > { %1737 = vmatprep.subr.bf16.mxu1 %v3949_v16  ;;  %v4031_v16 = vld [vmem:[#allocation2 + $0x588] ss:$16 sps:$4 sm:$0xff]  }
  0xa7   : > { %1656 = vmatpush2.bf16.msra.mxu0 %v3950_v19  ;;  %v4042_v19 = vld [vmem:[#allocation2 + $0x32c] ss:$16 sps:$4 sm:$0xff]  }
  0xa8   : > { %1738 = vmatpush2.bf16.msra.mxu1 %v3947_v18  ;;  %1754 = vmatprep.subr.bf16.mxu0 %v3958_v25  ;;  %v4039_v18 = vld [vmem:[#allocation2 + $0x56c] ss:$16 sps:$4 sm:$0xff]  }
  0xa9   : > { %1739 = vmatprep.subr.bf16.mxu1 %v3955_v24  ;;  %v4045_v24 = vld [vmem:[#allocation2 + $0x54c] ss:$16 sps:$4 sm:$0xff]  }
  0xaa   : > { %1658 = vmatmul.mubr.bf16.vlgmr.msra.gmra.mxu0 %v4494_v26  ;;  %v4048_v25 = vld [vmem:[#allocation2 + $0x30c] ss:$16 sps:$4 sm:$0xff]  }
  0xab   : > { %1755 = vmatpush1.bf16.msra.mxu0 %v3956_v28  ;;  %1786 = vmatprep.mubr.bf16.mxu0 %v4465_v54  ;;  %v3985_v54 = vld [vmem:[#allocation2 + $0x48c] ss:$16 sps:$4 sm:$0xff]   ;;  %v4046_v28 = vld [vmem:[#allocation2 + $0x308] ss:$16 sps:$4 sm:$0xff]  }
  0xac   : > { %1740 = vmatpush2.bf16.msra.mxu1 %v3953_v27  ;;  %1756 = vmatprep.subr.bf16.mxu0 %v3964_v30  ;;  %v4043_v27 = vld [vmem:[#allocation2 + $0x548] ss:$16 sps:$4 sm:$0xff]   ;;  %v4054_v30 = vld [vmem:[#allocation2 + $0x60c] ss:$16 sps:$4 sm:$0xff]  }
  0xad   : > { %1741 = vmatprep.subr.bf16.mxu1 %v3961_v29  ;;  %v4051_v29 = vld [vmem:[#allocation2 + $0x52c] ss:$16 sps:$4 sm:$0xff]  }
  0xaf   : > { %1757 = vmatpush1.bf16.msra.mxu0 %v3962_v32  ;;  %v4052_v32 = vld [vmem:[#allocation2 + $0x608] ss:$16 sps:$4 sm:$0xff]  }
  0xb0   : > { %1742 = vmatpush2.bf16.msra.mxu1 %v3959_v31  ;;  %1758 = vmatprep.subr.bf16.mxu0 %v3970_v34  ;;  %v4049_v31 = vld [vmem:[#allocation2 + $0x528] ss:$16 sps:$4 sm:$0xff]   ;;  %v4060_v34 = vld [vmem:[#allocation4 + $0xe4] ss:$16 sps:$4 sm:$0xff]  }
  0xb1   : > { %1797 = vmatprep.subr.bf16.mxu1 %v3967_v33  ;;  %v4057_v33 = vld [vmem:[#allocation2 + $0x50c] ss:$16 sps:$4 sm:$0xff]  }
  0xb3   : > { %1744 = vmatmul.mubr.bf16.vlgmr.msra.gmra.mxu1 %v4473_v12  ;;  %1759 = vmatpush1.bf16.msra.mxu0 %v3968_v36  ;;  %v3986_v12 = vld [vmem:[#allocation2 + $0x248] ss:$16 sps:$4 sm:$0xff]   ;;  %v4058_v36 = vld [vmem:[#allocation4 + $0xe0] ss:$16 sps:$4 sm:$0xff]  }
  0xb4   : > { %1798 = vmatpush1.bf16.msra.mxu1 %v3965_v35  ;;  %1760 = vmatprep.subr.bf16.mxu0 %v3976_v38  ;;  %v4055_v35 = vld [vmem:[#allocation2 + $0x508] ss:$16 sps:$4 sm:$0xff]   ;;  %v4061_v38 = vld [vmem:[#allocation4 + $0xc0] ss:$16 sps:$4 sm:$0xff]  }
  0xb5   : > { %1799 = vmatprep.subr.bf16.mxu1 %v3973_v37  ;;  %1829 = vmatprep.mubr.bf16.mxu1 %v4489_v44  ;;  %v3997_v44 = vld [vmem:[#allocation2 + $0x44c] ss:$16 sps:$4 sm:$0xff]   ;;  %v4063_v37 = vld [vmem:[#allocation4 + $0xc4] ss:$16 sps:$4 sm:$0xff]  }
  0xb7   : > { %1761 = vmatpush1.bf16.msra.mxu0 %v3974_v40  ;;  %v4064_v40 = vld [vmem:[#allocation4 + $0xa0] ss:$16 sps:$4 sm:$0xff]  }
  0xb8   : > { %1800 = vmatpush1.bf16.msra.mxu1 %v3971_v39  ;;  %1762 = vmatprep.subr.bf16.mxu0 %v3982_v42  ;;  %v4066_v39 = vld [vmem:[#allocation4 + $0xa4] ss:$16 sps:$4 sm:$0xff]   ;;  %v4070_v42 = vld [vmem:[#allocation4 + $0x60] ss:$16 sps:$4 sm:$0xff]  }
  0xb9   : > { %1801 = vmatprep.subr.bf16.mxu1 %v3979_v41  ;;  %v4067_v41 = vld [vmem:[#allocation4 + $0x80] ss:$16 sps:$4 sm:$0xff]  }
  0xbb   : > { %1763 = vmatpush1.bf16.msra.mxu0 %v3980_v45  ;;  %v4114_v45 = vld [vmem:[#allocation4 + $0x2e4] ss:$16 sps:$4 sm:$0xff]  }
  0xbc   : > { %1802 = vmatpush1.bf16.msra.mxu1 %v3977_v43  ;;  %1764 = vmatprep.subr.bf16.mxu0 %v3988_v46  ;;  %v4112_v43 = vld [vmem:[#allocation4 + $0x2e0] ss:$16 sps:$4 sm:$0xff]   ;;  %v4120_v46 = vld [vmem:[#allocation4 + $0x2c4] ss:$16 sps:$4 sm:$0xff]  }
  0xbd   : > { %1803 = vmatprep.subr.bf16.mxu1 %v3985_v54  ;;  %v4118_v54 = vld [vmem:[#allocation4 + $0x2c0] ss:$16 sps:$4 sm:$0xff]  }
  0xbf   : > { %1765 = vmatpush1.bf16.msra.mxu0 %v3986_v12  ;;  %v4076_v12 = vld [vmem:[#allocation4 + $0x20] ss:$16 sps:$4 sm:$0xff]  }
  0xc0   : > { %1804 = vmatpush1.bf16.msra.mxu1 %v3983_v47  ;;  %1766 = vmatprep.subr.bf16.mxu0 %v3994_v49  ;;  %v4078_v47 = vld [vmem:[#allocation4 + $0x24] ss:$16 sps:$4 sm:$0xff]  }
  0xc1   : > { %1805 = vmatprep.subr.bf16.mxu1 %v3991_v48  ;;  %v4124_v48 = vld [vmem:[#allocation4 + $0x2a0] ss:$16 sps:$4 sm:$0xff]   ;;  %v4126_v49 = vld [vmem:[#allocation4 + $0x2a4] ss:$16 sps:$4 sm:$0xff]  }
  0xc3   : > { %1767 = vmatpush1.bf16.msra.mxu0 %v3992_v51  ;;  %v4079_v51 = vld [vmem:[#allocation4] ss:$16 sps:$4 sm:$0xff]  }
  0xc4   : > { %1806 = vmatpush1.bf16.msra.mxu1 %v3989_v50  ;;  %1768 = vmatprep.subr.bf16.mxu0 %v4000_v52  ;;  %v4081_v50 = vld [vmem:[#allocation4 + $0x4] ss:$16 sps:$4 sm:$0xff]  }
  0xc5   : > { %1807 = vmatprep.subr.bf16.mxu1 %v3997_v44  ;;  %v4130_v44 = vld [vmem:[#allocation4 + $0x280] ss:$16 sps:$4 sm:$0xff]   ;;  %v4132_v52 = vld [vmem:[#allocation4 + $0x284] ss:$16 sps:$4 sm:$0xff]  }
  0xc7   : > { %1769 = vmatpush1.bf16.msra.mxu0 %v3998_v55  ;;  %v4082_v55 = vld [vmem:[#allocation4 + $0x1e0] ss:$16 sps:$4 sm:$0xff]  }
  0xc8   : > { %1808 = vmatpush1.bf16.msra.mxu1 %v3995_v53  ;;  %1770 = vmatprep.subr.bf16.mxu0 %v4006_v57  ;;  %v4084_v53 = vld [vmem:[#allocation4 + $0x1e4] ss:$16 sps:$4 sm:$0xff]  }
  0xc9   : > { %1809 = vmatprep.subr.bf16.mxu1 %v4003_v56  ;;  %v4136_v56 = vld [vmem:[#allocation4 + $0x260] ss:$16 sps:$4 sm:$0xff]   ;;  %v4138_v57 = vld [vmem:[#allocation4 + $0x264] ss:$16 sps:$4 sm:$0xff]  }
  0xcb   : > { %1771 = vmatpush2.bf16.msra.mxu0 %v4004_v59  ;;  %v4085_v59 = vld [vmem:[#allocation4 + $0x1c0] ss:$16 sps:$4 sm:$0xff]  }
  0xcc   : > { %1810 = vmatpush1.bf16.msra.mxu1 %v4001_v58  ;;  %1772 = vmatprep.subr.bf16.mxu0 %v4012_v61  ;;  %v4087_v58 = vld [vmem:[#allocation4 + $0x1c4] ss:$16 sps:$4 sm:$0xff]  }
  0xcd   : > { %1811 = vmatprep.subr.bf16.mxu1 %v4009_v60  ;;  %v4142_v60 = vld [vmem:[#allocation4 + $0x240] ss:$16 sps:$4 sm:$0xff]   ;;  %v4144_v61 = vld [vmem:[#allocation4 + $0x244] ss:$16 sps:$4 sm:$0xff]  }
  0xcf   : > { %1773 = vmatpush2.bf16.msra.mxu0 %v4010_v63  ;;  %v4088_v63 = vld [vmem:[#allocation4 + $0x1a0] ss:$16 sps:$4 sm:$0xff]  }
  0xd0   : > { %1812 = vmatpush1.bf16.msra.mxu1 %v4007_v62  ;;  %1774 = vmatprep.subr.bf16.mxu0 %v4018_v1  ;;  %v4090_v62 = vld [vmem:[#allocation4 + $0x1a4] ss:$16 sps:$4 sm:$0xff]  }
  0xd1   : > { %1813 = vmatprep.subr.bf16.mxu1 %v4015_v0  ;;  %v4148_v0 = vld [vmem:[#allocation4 + $0x220] ss:$16 sps:$4 sm:$0xff]   ;;  %v4150_v1 = vld [vmem:[#allocation4 + $0x224] ss:$16 sps:$4 sm:$0xff]  }
  0xd3   : > { %1775 = vmatpush2.bf16.msra.mxu0 %v4016_v3  ;;  %v4091_v3 = vld [vmem:[#allocation4 + $0x180] ss:$16 sps:$4 sm:$0xff]  }
  0xd4   : > { %1814 = vmatpush2.bf16.msra.mxu1 %v4013_v2  ;;  %1776 = vmatprep.subr.bf16.mxu0 %v4024_v5  ;;  %v4093_v2 = vld [vmem:[#allocation4 + $0x184] ss:$16 sps:$4 sm:$0xff]  }
  0xd5   : > { %1815 = vmatprep.subr.bf16.mxu1 %v4021_v4  ;;  %v4154_v4 = vld [vmem:[#allocation4 + $0x200] ss:$16 sps:$4 sm:$0xff]   ;;  %v4156_v5 = vld [vmem:[#allocation4 + $0x204] ss:$16 sps:$4 sm:$0xff]  }
  0xd7   : > { %1777 = vmatpush2.bf16.msra.mxu0 %v4022_v7  ;;  %v4094_v7 = vld [vmem:[#allocation4 + $0x160] ss:$16 sps:$4 sm:$0xff]  }
  0xd8   : > { %1816 = vmatpush2.bf16.msra.mxu1 %v4019_v6  ;;  %1778 = vmatprep.subr.bf16.mxu0 %v4030_v9  ;;  %v4096_v6 = vld [vmem:[#allocation4 + $0x164] ss:$16 sps:$4 sm:$0xff]  }
  0xd9   : > { %1817 = vmatprep.subr.bf16.mxu1 %v4027_v8  ;;  %v4160_v8 = vld [vmem:[#allocation4 + $0x3e0] ss:$16 sps:$4 sm:$0xff]   ;;  %v4162_v9 = vld [vmem:[#allocation4 + $0x3e4] ss:$16 sps:$4 sm:$0xff]  }
  0xdb   : > { %1779 = vmatpush2.bf16.msra.mxu0 %v4028_v11  ;;  %v4097_v11 = vld [vmem:[#allocation4 + $0x140] ss:$16 sps:$4 sm:$0xff]  }
  0xdc   : > { %1818 = vmatpush2.bf16.msra.mxu1 %v4025_v10  ;;  %1780 = vmatprep.subr.bf16.mxu0 %v4036_v15  ;;  %v4099_v10 = vld [vmem:[#allocation4 + $0x144] ss:$16 sps:$4 sm:$0xff]  }
  0xdd   : > { %1819 = vmatprep.subr.bf16.mxu1 %v4033_v14  ;;  %v4166_v14 = vld [vmem:[#allocation4 + $0x3c0] ss:$16 sps:$4 sm:$0xff]   ;;  %v4168_v15 = vld [vmem:[#allocation4 + $0x3c4] ss:$16 sps:$4 sm:$0xff]  }
  0xdf   : > { %1781 = vmatpush2.bf16.msra.mxu0 %v4034_v17  ;;  %v4100_v17 = vld [vmem:[#allocation4 + $0x120] ss:$16 sps:$4 sm:$0xff]  }
  0xe0   : > { %1820 = vmatpush2.bf16.msra.mxu1 %v4031_v16  ;;  %1782 = vmatprep.subr.bf16.mxu0 %v4042_v19  ;;  %v4102_v16 = vld [vmem:[#allocation4 + $0x124] ss:$16 sps:$4 sm:$0xff]  }
  0xe1   : > { %1821 = vmatprep.subr.bf16.mxu1 %v4039_v18  ;;  %v4172_v18 = vld [vmem:[#allocation4 + $0x3a0] ss:$16 sps:$4 sm:$0xff]   ;;  %v4174_v19 = vld [vmem:[#allocation4 + $0x3a4] ss:$16 sps:$4 sm:$0xff]  }
  0xe3   : > { %1783 = vmatpush2.bf16.msra.mxu0 %v4040_v22  ;;  %v4103_v22 = vld [vmem:[#allocation4 + $0x100] ss:$16 sps:$4 sm:$0xff]  }
  0xe4   : > { %1822 = vmatpush2.bf16.msra.mxu1 %v4037_v20  ;;  %1784 = vmatprep.subr.bf16.mxu0 %v4048_v25  ;;  %v4105_v20 = vld [vmem:[#allocation4 + $0x104] ss:$16 sps:$4 sm:$0xff]   ;;  %v4108_v25 = vld [vmem:[#allocation4 + $0xec] ss:$16 sps:$4 sm:$0xff]  }
  0xe5   : > { %1823 = vmatprep.subr.bf16.mxu1 %v4045_v24  ;;  %v4180_v24 = vld [vmem:[#allocation4 + $0x384] ss:$16 sps:$4 sm:$0xff]  }
  0xe7   : > { %1785 = vmatpush2.bf16.msra.mxu0 %v4046_v28  ;;  %v4186_v28 = vld [vmem:[#allocation4 + $0x364] ss:$16 sps:$4 sm:$0xff]  }
  0xe8   : > { %1824 = vmatpush2.bf16.msra.mxu1 %v4043_v27  ;;  %1854 = vmatprep.subr.bf16.mxu0 %v4054_v30  ;;  %v4178_v27 = vld [vmem:[#allocation4 + $0x380] ss:$16 sps:$4 sm:$0xff]   ;;  %v4192_v30 = vld [vmem:[#allocation4 + $0x344] ss:$16 sps:$4 sm:$0xff]  }
  0xe9   : > { %1825 = vmatprep.subr.bf16.mxu1 %v4051_v29  ;;  %v4184_v29 = vld [vmem:[#allocation4 + $0x360] ss:$16 sps:$4 sm:$0xff]  }
  0xea   : > { %1787 = vmatmul.mubr.bf16.vlgmr.msra.gmra.mxu0 %v4475_v13  ;;  %v4069_v13 = vld [vmem:[#allocation4 + $0x84] ss:$16 sps:$4 sm:$0xff]  }
  0xeb   : > { %1855 = vmatpush1.bf16.msra.mxu0 %v4052_v32  ;;  %1872 = vmatprep.mubr.bf16.mxu0 %v4354_v21  ;;  %v4072_v21 = vld [vmem:[#allocation4 + $0x64] ss:$16 sps:$4 sm:$0xff]  }
  0xec   : > { %1826 = vmatpush2.bf16.msra.mxu1 %v4049_v31  ;;  %2685 = vmatprep.subr.bf16.mxu0 %v4060_v34  ;;  %v4190_v31 = vld [vmem:[#allocation4 + $0x340] ss:$16 sps:$4 sm:$0xff]   ;;  %v4198_v32 = vld [vmem:[#allocation4 + $0x324] ss:$16 sps:$4 sm:$0xff]  }
  0xed   : > { %1827 = vmatprep.subr.bf16.mxu1 %v4057_v33  ;;  %v4196_v33 = vld [vmem:[#allocation4 + $0x320] ss:$16 sps:$4 sm:$0xff]   ;;  %v4201_v34 = vld [vmem:[#allocation4 + $0x304] ss:$16 sps:$4 sm:$0xff]  }
  0xf0   : > { %1828 = vmatpush2.bf16.msra.mxu1 %v4055_v35  ;;  %v4199_v35 = vld [vmem:[#allocation4 + $0x300] ss:$16 sps:$4 sm:$0xff]  }
  0xf1   : > { %2728 = vmatprep.subr.bf16.mxu1 %v4114_v45  ;;  %v4512_v45 = vld [vmem:[%s4655_s2] sm:$0xf] }
  0xf2   : > { %3514 = vmatmul.mubr.msk.bf16.vlgmr.msra.gmra.mxu0 %vm1535_vm0, %v4482_v23  ;;  %v4073_v23 = vld [vmem:[#allocation4 + $0x40] ss:$16 sps:$4 sm:$0xff]  }
  0xf3   : > { %1830 = vmatmul.mubr.bf16.vlgmr.msra.gmra.mxu1 %v4494_v26  ;;  %2686 = vmatpush1.bf16.msra.mxu0 %v4058_v36  ;;  %v4075_v26 = vld [vmem:[#allocation4 + $0x44] ss:$16 sps:$4 sm:$0xff]   ;;  %v4204_v36 = vld [vmem:[#allocation4 + $0x2ec] ss:$16 sps:$4 sm:$0xff]  }
  0xf4   : > { %2687 = vmatprep.subr.bf16.mxu0 %v4063_v37  ;;  %2729 = vmatpush1.bf16.msra.mxu1 %v4112_v43 }
  0xf5   : > { %2730 = vmatprep.subr.bf16.mxu1 %v4120_v46 }
  0xf7   : > { %2688 = vmatpush1.bf16.msra.mxu0 %v4061_v38  ;;  %v535_v38 = vlaneseq }
  0xf8   : > { %2689 = vmatprep.subr.bf16.mxu0 %v4066_v39  ;;  %2731 = vmatpush1.bf16.msra.mxu1 %v4118_v54 }
  0xf9   : > { %2732 = vmatprep.subr.bf16.mxu1 %v4126_v49 }
  0xfb   : > { %2690 = vmatpush1.bf16.msra.mxu0 %v4064_v40  ;;  %v4505_v40 = vshrl.u32 %v535_v38, 7  ;;  %v4163_v38 = vld [vmem:[#allocation4 + $0x1a8] ss:$16 sps:$4 sm:$0xff]  }
  0xfc   : > { %2691 = vmatprep.subr.bf16.mxu0 %v4069_v13  ;;  %2733 = vmatpush1.bf16.msra.mxu1 %v4124_v48 }
  0xfd   : > { %2734 = vmatprep.subr.bf16.mxu1 %v4132_v52 }
  0xff   : > { %2692 = vmatpush1.bf16.msra.mxu0 %v4067_v41 }
 0x100   : > { %2693 = vmatprep.subr.bf16.mxu0 %v4072_v21  ;;  %2735 = vmatpush1.bf16.msra.mxu1 %v4130_v44  ;;  %v541_v21 = vsub.s32 1, %v4505_v40 }
 0x101   : > { %2736 = vmatprep.subr.bf16.mxu1 %v4138_v57 }
 0x103   : > { %2694 = vmatpush1.bf16.msra.mxu0 %v4070_v42  ;;  %v537_v42 = vsub.s32 0, %v4505_v40 }
 0x104   : > { %2695 = vmatprep.subr.bf16.mxu0 %v4075_v26  ;;  %2737 = vmatpush1.bf16.msra.mxu1 %v4136_v56 }
 0x105   : > { %2738 = vmatprep.subr.bf16.mxu1 %v4144_v61  ;;  %v538_v54 = vrot.slane %v4512_v45, %v537_v42 }
 0x107   : > { %2696 = vmatpush1.bf16.msra.mxu0 %v4073_v23  ;;  %v542_v23 = vrot.slane %v4512_v45, %v541_v21 }
 0x108   : > { %2697 = vmatprep.subr.bf16.mxu0 %v4078_v47  ;;  %2739 = vmatpush1.bf16.msra.mxu1 %v4142_v60 }
 0x109   : > { %2740 = vmatprep.subr.bf16.mxu1 %v4150_v1 }
 0x10b   : > { %2698 = vmatpush1.bf16.msra.mxu0 %v4076_v12 }
 0x10c   : > { %2699 = vmatprep.subr.bf16.mxu0 %v4081_v50  ;;  %2741 = vmatpush1.bf16.msra.mxu1 %v4148_v0 }
 0x10d   : > { %2742 = vmatprep.subr.bf16.mxu1 %v4156_v5 }
 0x10f   : > { %2700 = vmatpush1.bf16.msra.mxu0 %v4079_v51 }
 0x110   : > { %2701 = vmatprep.subr.bf16.mxu0 %v4084_v53  ;;  %2743 = vmatpush1.bf16.msra.mxu1 %v4154_v4 }
 0x111   : > { %2744 = vmatprep.subr.bf16.mxu1 %v4162_v9 }
 0x113   : > { %2702 = vmatpush2.bf16.msra.mxu0 %v4082_v55 }
 0x114   : > { %2703 = vmatprep.subr.bf16.mxu0 %v4087_v58  ;;  %2745 = vmatpush2.bf16.msra.mxu1 %v4160_v8 }
 0x115   : > { %2746 = vmatprep.subr.bf16.mxu1 %v4168_v15 }
 0x117   : > { %2704 = vmatpush2.bf16.msra.mxu0 %v4085_v59 }
 0x118   : > { %2705 = vmatprep.subr.bf16.mxu0 %v4090_v62  ;;  %2747 = vmatpush2.bf16.msra.mxu1 %v4166_v14  ;;  %v4106_v14 = vld [vmem:[#allocation4 + $0xe8] ss:$16 sps:$4 sm:$0xff]  }
 0x119   : > { %2748 = vmatprep.subr.bf16.mxu1 %v4174_v19  ;;  %v4115_v19 = vld [vmem:[#allocation4 + $0xa8] ss:$16 sps:$4 sm:$0xff]  }
 0x11b   : > { %2706 = vmatpush2.bf16.msra.mxu0 %v4088_v63 }
 0x11c   : > { %2707 = vmatprep.subr.bf16.mxu0 %v4093_v2  ;;  %2749 = vmatpush2.bf16.msra.mxu1 %v4172_v18  ;;  %v4117_v18 = vld [vmem:[#allocation4 + $0xac] ss:$16 sps:$4 sm:$0xff]  }
 0x11d   : > { %2750 = vmatprep.subr.bf16.mxu1 %v4180_v24  ;;  %v4129_v24 = vld [vmem:[#allocation4 + $0x6c] ss:$16 sps:$4 sm:$0xff]  }
 0x11f   : > { %2708 = vmatpush2.bf16.msra.mxu0 %v4091_v3 }
 0x120   : > { %2709 = vmatprep.subr.bf16.mxu0 %v4096_v6  ;;  %2751 = vmatpush2.bf16.msra.mxu1 %v4178_v27  ;;  %v4135_v27 = vld [vmem:[#allocation4 + $0x4c] ss:$16 sps:$4 sm:$0xff]  }
 0x121   : > { %2752 = vmatprep.subr.bf16.mxu1 %v4186_v28  ;;  %v4133_v28 = vld [vmem:[#allocation4 + $0x48] ss:$16 sps:$4 sm:$0xff]  }
 0x123   : > { %2710 = vmatpush2.bf16.msra.mxu0 %v4094_v7 }
 0x124   : > { %2711 = vmatprep.subr.bf16.mxu0 %v4099_v10  ;;  %2753 = vmatpush2.bf16.msra.mxu1 %v4184_v29  ;;  %v4141_v29 = vld [vmem:[#allocation4 + $0x2c] ss:$16 sps:$4 sm:$0xff]  }
 0x125   : > { %2754 = vmatprep.subr.bf16.mxu1 %v4192_v30  ;;  %v4139_v30 = vld [vmem:[#allocation4 + $0x28] ss:$16 sps:$4 sm:$0xff]  }
 0x127   : > { %2712 = vmatpush2.bf16.msra.mxu0 %v4097_v11 }
 0x128   : > { %2713 = vmatprep.subr.bf16.mxu0 %v4102_v16  ;;  %2755 = vmatpush2.bf16.msra.mxu1 %v4190_v31  ;;  %v4111_v16 = vld [vmem:[#allocation4 + $0xcc] ss:$16 sps:$4 sm:$0xff]  }
 0x129   : > { %2756 = vmatprep.subr.bf16.mxu1 %v4198_v32  ;;  %v4147_v31 = vld [vmem:[#allocation4 + $0xc] ss:$16 sps:$4 sm:$0xff]   ;;  %v4145_v32 = vld [vmem:[#allocation4 + $0x8] ss:$16 sps:$4 sm:$0xff]  }
 0x12a   : > { %v1573_v13 = vpop.f32.mrf.mxu0 }
 0x12b   : > { %2714 = vmatpush2.bf16.msra.mxu0 %v4100_v17  ;;  %v1616_v37 = vpop.f32.mrf.mxu1  ;;  %v1574_v48 = vadd.f32 %v1573_v13, %v538_v54  ;;  %v4109_v17 = vld [vmem:[#allocation4 + $0xc8] ss:$16 sps:$4 sm:$0xff]  }
 0x12c   : > { %2715 = vmatprep.subr.bf16.mxu0 %v4105_v20  ;;  %2757 = vmatpush2.bf16.msra.mxu1 %v4196_v33  ;;  %v1575_v43 = vpop.f32.mrf.mxu0  ;;  %v4123_v20 = vld [vmem:[#allocation4 + $0x8c] ss:$16 sps:$4 sm:$0xff]   ;;  %v4169_v13 = vld [vmem:[#allocation4 + $0x188] ss:$16 sps:$4 sm:$0xff]  }
 0x12d   : > { %2758 = vmatprep.subr.bf16.mxu1 %v4201_v34  ;;  %v1618_v39 = vpop.f32.mrf.mxu1  ;;  %v1576_v12 = vadd.f32 %v1575_v43, %v542_v23  ;;  %v1617_v55 = vadd.f32 %v1616_v37, %v1574_v48  ;;  %v4153_v33 = vld [vmem:[#allocation4 + $0x1ec] ss:$16 sps:$4 sm:$0xff]   ;;  %v4151_v34 = vld [vmem:[#allocation4 + $0x1e8] ss:$16 sps:$4 sm:$0xff]  }
 0x12e   : > { %v1577_v46 = vpop.f32.mrf.mxu0  ;;  %v4165_v37 = vld [vmem:[#allocation4 + $0x1ac] ss:$16 sps:$4 sm:$0xff]   ;;  %v4181_v48 = vld [vmem:[#allocation4 + $0x148] ss:$16 sps:$4 sm:$0xff]  }
 0x12f   : > { %2716 = vmatpush2.bf16.msra.mxu0 %v4103_v22  ;;  %v1620_v41 = vpop.f32.mrf.mxu1  ;;  %v1578_v50 = vadd.f32 %v1577_v46, %v538_v54  ;;  %v1619_v52 = vadd.f32 %v1618_v39, %v1576_v12  ;;  %v4121_v22 = vld [vmem:[#allocation4 + $0x88] ss:$16 sps:$4 sm:$0xff]   ;;  %v4171_v39 = vld [vmem:[#allocation4 + $0x18c] ss:$16 sps:$4 sm:$0xff]   ;;  %v549_v46 = vsub.s32 3, %v4505_v40 }
 0x130   : > { %2771 = vmatprep.subr.bf16.mxu0 %v4108_v25  ;;  %2759 = vmatpush2.bf16.msra.mxu1 %v4199_v35  ;;  %v1579_v49 = vpop.f32.mrf.mxu0  ;;  %v4127_v25 = vld [vmem:[#allocation4 + $0x68] ss:$16 sps:$4 sm:$0xff]   ;;  %v4159_v35 = vld [vmem:[#allocation4 + $0x1cc] ss:$16 sps:$4 sm:$0xff]  }
 0x131   : > { %2814 = vmatprep.subr.bf16.mxu1 %v4204_v36  ;;  %v1622_v26 = vpop.f32.mrf.mxu1  ;;  %v1580_v53 = vadd.f32 %v1579_v49, %v542_v23  ;;  %v1621_v57 = vadd.f32 %v1620_v41, %v1578_v50  ;;  %v4157_v36 = vld [vmem:[#allocation4 + $0x1c8] ss:$16 sps:$4 sm:$0xff]   ;;  %v4177_v43 = vld [vmem:[#allocation4 + $0x16c] ss:$16 sps:$4 sm:$0xff]  }
 0x132   : > { %v4183_v54 = vld [vmem:[#allocation4 + $0x14c] ss:$16 sps:$4 sm:$0xff]  }
 0x133   : > { %v1702_v47 = vpop.f32.mrf.mxu1  ;;  %v1623_v62 = vadd.f32 %v1622_v26, %v1580_v53  ;;  %v4175_v26 = vld [vmem:[#allocation4 + $0x168] ss:$16 sps:$4 sm:$0xff]  }
 0x135   : > { %v1704_v51 = vpop.f32.mrf.mxu1 }
 0x137   : > { %v1706_v59 = vpop.f32.mrf.mxu1 }
 0x139   : > { %v1708_v4 = vpop.f32.mrf.mxu1 }
 0x16a   : > { %v1659_v44 = vpop.f32.mrf.mxu0 }
 0x16b   : > { %v1660_v60 = vadd.f32 %v1659_v44, %v1617_v55  ;;  %v550_v44 = vrot.slane %v4512_v45, %v549_v46  ;;  %v4187_v55 = vld [vmem:[#allocation4 + $0x128] ss:$16 sps:$4 sm:$0xff]  }
 0x16c   : > { %v1661_v56 = vpop.f32.mrf.mxu0 }
 0x16d   : > { %v1662_v58 = vadd.f32 %v1661_v56, %v1619_v52  ;;  %v1703_v5 = vadd.f32 %v1702_v47, %v1660_v60  ;;  %v545_v47 = vsub.s32 2, %v4505_v40 }
 0x16e   : > { %v1663_v61 = vpop.f32.mrf.mxu0 }
 0x16f   : > { %v1664_v63 = vadd.f32 %v1663_v61, %v1621_v57  ;;  %v1705_v1 = vadd.f32 %v1704_v51, %v1662_v58  ;;  %v1883_v10 = vmax.f32 %v1703_v5, 0.0  ;;  %v4189_v51 = vld [vmem:[#allocation4 + $0x12c] ss:$16 sps:$4 sm:$0xff]   ;;  %v546_v52 = vrot.slane %v4512_v45, %v545_v47 }
 0x170   : > { %v1665_v0 = vpop.f32.mrf.mxu0  ;;  %v4195_v58 = vld [vmem:[#allocation4 + $0x10c] ss:$16 sps:$4 sm:$0xff]  }
 0x171   : > { %v1707_v2 = vadd.f32 %v1706_v59, %v1664_v63  ;;  %v1666_v3 = vadd.f32 %v1665_v0, %v1623_v62  ;;  %v1884_v8 = vmax.f32 %v1705_v1, 0.0  ;;  %v4193_v1 = vld [vmem:[#allocation4 + $0x108] ss:$16 sps:$4 sm:$0xff]  }
 0x173   : > { %v1709_v6 = vadd.f32 %v1708_v4, %v1666_v3  ;;  %v1887_v7 = vmax.f32 %v1707_v2, 0.0  ;;  %v1745_v41 = vpop.f32.mrf.mxu1 }
 0x174   : > { %v1746_v60 = vadd.f32 %v1745_v41, %v546_v52  ;;  %v4255_v41 = vld [vmem:[%s4658_s5 + $0x28] sm:$0xff]  }
 0x175   : > { %v1888_v9 = vmax.f32 %v1709_v6, 0.0  ;;  %v4520_v15 = vpack.c.bf16 %v1887_v7, %v1883_v10  ;;  %v1747_v23 = vpop.f32.mrf.mxu1 }
 0x176   : > { %v1748_v59 = vadd.f32 %v1747_v23, %v550_v44  ;;  %v4214_v23 = vld [vmem:[#allocation4 + $0x268] ss:$16 sps:$4 sm:$0xff]  }
 0x177   : > { %v1892_v11 = vpack.c.bf16 %v1888_v9, %v1884_v8  ;;  %v1749_v49 = vpop.f32.mrf.mxu1 }
 0x178   : > { %v1750_v63 = vadd.f32 %v1749_v49, %v546_v52  ;;  %v4220_v49 = vld [vmem:[#allocation4 + $0x228] ss:$16 sps:$4 sm:$0xff]  }
 0x179   : > { %2717 = vmatprep.mubr.bf16.mxu0 %v1892_v11  ;;  %v1751_v56 = vpop.f32.mrf.mxu1  ;;  %v4226_v52 = vld [vmem:[#allocation4 + $0x3e8] ss:$16 sps:$4 sm:$0xff]  }
 0x17a   : > { %2718 = vmatmul.mubr.bf16.vlgmr.msra.gmra.mxu0 %v4520_v15  ;;  %v1752_v45 = vadd.f32 %v1751_v56, %v550_v44  ;;  %v4228_v44 = vld [vmem:[#allocation4 + $0x3ec] ss:$16 sps:$4 sm:$0xff]  }
 0x17b   : > { %2772 = vmatpush1.bf16.msra.mxu0 %v4106_v14  ;;  %2803 = vmatprep.mubr.bf16.mxu0 %v1892_v11  ;;  %v4234_v56 = vld [vmem:[#allocation4 + $0x3ac] ss:$16 sps:$4 sm:$0xff]  }
 0x17c   : > { %2773 = vmatprep.subr.bf16.mxu0 %v4111_v16 }
 0x17f   : > { %2774 = vmatpush1.bf16.msra.mxu0 %v4109_v17 }
 0x180   : > { %2775 = vmatprep.subr.bf16.mxu0 %v4117_v18 }
 0x183   : > { %2776 = vmatpush1.bf16.msra.mxu0 %v4115_v19 }
 0x184   : > { %2777 = vmatprep.subr.bf16.mxu0 %v4123_v20 }
 0x187   : > { %2778 = vmatpush1.bf16.msra.mxu0 %v4121_v22 }
 0x188   : > { %2779 = vmatprep.subr.bf16.mxu0 %v4129_v24 }
 0x18b   : > { %2780 = vmatpush1.bf16.msra.mxu0 %v4127_v25 }
 0x18c   : > { %2781 = vmatprep.subr.bf16.mxu0 %v4135_v27 }
 0x18f   : > { %2782 = vmatpush1.bf16.msra.mxu0 %v4133_v28 }
 0x190   : > { %2783 = vmatprep.subr.bf16.mxu0 %v4141_v29 }
 0x193   : > { %2784 = vmatpush1.bf16.msra.mxu0 %v4139_v30  ;;  %v4202_v30 = vld [vmem:[#allocation4 + $0x2e8] ss:$16 sps:$4 sm:$0xff]  }
 0x194   : > { %2785 = vmatprep.subr.bf16.mxu0 %v4147_v31 }
 0x197   : > { %2786 = vmatpush1.bf16.msra.mxu0 %v4145_v32  ;;  %v4207_v32 = vld [vmem:[#allocation4 + $0x2cc] ss:$16 sps:$4 sm:$0xff]  }
 0x198   : > { %2787 = vmatprep.subr.bf16.mxu0 %v4153_v33  ;;  %v4250_v33 = vld [vmem:[%s4658_s5 + $0x78] sm:$0xff]  }
 0x19b   : > { %2788 = vmatpush2.bf16.msra.mxu0 %v4151_v34  ;;  %v4251_v34 = vld [vmem:[%s4658_s5 + $0x38] sm:$0xff]  }
 0x19c   : > { %2789 = vmatprep.subr.bf16.mxu0 %v4159_v35  ;;  %v4205_v35 = vld [vmem:[#allocation4 + $0x2c8] ss:$16 sps:$4 sm:$0xff]  }
 0x19f   : > { %2790 = vmatpush2.bf16.msra.mxu0 %v4157_v36  ;;  %v4210_v36 = vld [vmem:[#allocation4 + $0x2ac] ss:$16 sps:$4 sm:$0xff]  }
 0x1a0   : > { %2791 = vmatprep.subr.bf16.mxu0 %v4165_v37  ;;  %v4253_v37 = vld [vmem:[%s4658_s5 + $0x30] sm:$0xff]  }
 0x1a3   : > { %2792 = vmatpush2.bf16.msra.mxu0 %v4163_v38  ;;  %v4254_v38 = vld [vmem:[%s4658_s5 + $0x68] sm:$0xff]  }
 0x1a4   : > { %2793 = vmatprep.subr.bf16.mxu0 %v4171_v39  ;;  %v4208_v39 = vld [vmem:[#allocation4 + $0x2a8] ss:$16 sps:$4 sm:$0xff]  }
 0x1a7   : > { %2794 = vmatpush2.bf16.msra.mxu0 %v4169_v13  ;;  %v4213_v13 = vld [vmem:[#allocation4 + $0x28c] ss:$16 sps:$4 sm:$0xff]  }
 0x1a8   : > { %2795 = vmatprep.subr.bf16.mxu0 %v4177_v43  ;;  %v4211_v43 = vld [vmem:[#allocation4 + $0x288] ss:$16 sps:$4 sm:$0xff]  }
 0x1aa   : > { %v1788_v12 = vpop.f32.mrf.mxu0 }
 0x1ab   : > { %2796 = vmatpush2.bf16.msra.mxu0 %v4175_v26  ;;  %v1789_v2 = vadd.f32 %v1788_v12, %v1746_v60  ;;  %v4216_v26 = vld [vmem:[#allocation4 + $0x26c] ss:$16 sps:$4 sm:$0xff]   ;;  %v4217_v12 = vld [vmem:[#allocation4 + $0x248] ss:$16 sps:$4 sm:$0xff]  }
 0x1ac   : > { %v1790_v50 = vpop.f32.mrf.mxu0  ;;  %2797 = vmatprep.subr.bf16.mxu0 %v4183_v54  ;;  %v4219_v54 = vld [vmem:[#allocation4 + $0x24c] ss:$16 sps:$4 sm:$0xff]  }
 0x1ad   : > { %v1791_v0 = vadd.f32 %v1790_v50, %v1748_v59  ;;  %v4225_v50 = vld [vmem:[#allocation4 + $0x20c] ss:$16 sps:$4 sm:$0xff]   ;;  %v4235_v59 = vld [vmem:[#allocation4 + $0x388] ss:$16 sps:$4 sm:$0xff]  }
 0x1ae   : > { %v1792_v53 = vpop.f32.mrf.mxu0  ;;  %v4240_v60 = vld [vmem:[#allocation4 + $0x36c] ss:$16 sps:$4 sm:$0xff]  }
 0x1af   : > { %2798 = vmatpush2.bf16.msra.mxu0 %v4181_v48  ;;  %v1793_v5 = vadd.f32 %v1792_v53, %v1750_v63  ;;  %v4222_v48 = vld [vmem:[#allocation4 + $0x22c] ss:$16 sps:$4 sm:$0xff]   ;;  %v4241_v63 = vld [vmem:[#allocation4 + $0x348] ss:$16 sps:$4 sm:$0xff]  }
 0x1b0   : > { %v1794_v57 = vpop.f32.mrf.mxu0  ;;  %2799 = vmatprep.subr.bf16.mxu0 %v4189_v51  ;;  %v4223_v51 = vld [vmem:[#allocation4 + $0x208] ss:$16 sps:$4 sm:$0xff]   ;;  %v4231_v53 = vld [vmem:[#allocation4 + $0x3cc] ss:$16 sps:$4 sm:$0xff]  }
 0x1b1   : > { %v1795_v10 = vadd.f32 %v1794_v57, %v1752_v45  ;;  %v4232_v57 = vld [vmem:[#allocation4 + $0x3a8] ss:$16 sps:$4 sm:$0xff]   ;;  %v4257_v45 = vld [vmem:[%s4658_s5 + $0x20] sm:$0xff]  }
 0x1b2   : > { %v1874_v62 = vpop.f32.mrf.mxu0 }
 0x1b3   : > { %v1831_v61 = vpop.f32.mrf.mxu1  ;;  %2800 = vmatpush2.bf16.msra.mxu0 %v4187_v55  ;;  %v4229_v55 = vld [vmem:[#allocation4 + $0x3c8] ss:$16 sps:$4 sm:$0xff]  }
 0x1b4   : > { %v1876_v4 = vpop.f32.mrf.mxu0  ;;  %2801 = vmatprep.subr.bf16.mxu0 %v4195_v58  ;;  %v1832_v7 = vadd.f32 %v1831_v61, %v1789_v2  ;;  %v4237_v58 = vld [vmem:[#allocation4 + $0x38c] ss:$16 sps:$4 sm:$0xff]   ;;  %v4238_v61 = vld [vmem:[#allocation4 + $0x368] ss:$16 sps:$4 sm:$0xff]  }
 0x1b5   : > { %v1833_v3 = vpop.f32.mrf.mxu1  ;;  %v4249_v2 = vld [vmem:[#allocation4 + $0x30c] ss:$16 sps:$4 sm:$0xff]  }
 0x1b6   : > { %v1834_v6 = vadd.f32 %v1833_v3, %v1791_v0  ;;  %v1878_v9 = vpop.f32.mrf.mxu0  ;;  %v1875_v20 = vadd.f32 %v1874_v62, %v1832_v7  ;;  %v4243_v62 = vld [vmem:[#allocation4 + $0x34c] ss:$16 sps:$4 sm:$0xff]   ;;  %v4247_v3 = vld [vmem:[#allocation4 + $0x308] ss:$16 sps:$4 sm:$0xff]   ;;  %v4260_v7 = vld [vmem:[%s4658_s5 + $0x50] sm:$0xff]  }
 0x1b7   : > { %v1835_v8 = vpop.f32.mrf.mxu1  ;;  %2802 = vmatpush2.bf16.msra.mxu0 %v4193_v1  ;;  %v4246_v0 = vld [vmem:[#allocation4 + $0x32c] ss:$16 sps:$4 sm:$0xff]   ;;  %v4244_v1 = vld [vmem:[#allocation4 + $0x328] ss:$16 sps:$4 sm:$0xff]  }
 0x1b8   : > { %v1836_v11 = vadd.f32 %v1835_v8, %v1793_v5  ;;  %v1880_v16 = vpop.f32.mrf.mxu0  ;;  %v1877_v17 = vadd.f32 %v1876_v4, %v1834_v6  ;;  %v1885_v28 = vmax.f32 %v1875_v20, 0.0  ;;  %3687 = vmatprep.subr.bf16.mxu0 %v4250_v33  ;;  %v4256_v4 = vld [vmem:[%s4658_s5 + $0x60] sm:$0xff]   ;;  %v4258_v5 = vld [vmem:[%s4658_s5 + $0x58] sm:$0xff]   ;;  %v4261_v8 = vld [vmem:[%s4658_s5 + $0x10] sm:$0xff]  }
 0x1b9   : > { %v1837_v14 = vpop.f32.mrf.mxu1  ;;  %v4259_v6 = vld [vmem:[%s4658_s5 + $0x18] sm:$0xff]   ;;  %v4270_v20 = vld [vmem:[%s4658_s5 + $0xe8] sm:$0xff]   ;;  %v4280_v33 = vld [vmem:[%s4658_s5 + $0xc0] sm:$0xff]  }
 0x1ba   : > { %v1879_v18 = vadd.f32 %v1878_v9, %v1836_v11  ;;  %v1838_v19 = vadd.f32 %v1837_v14, %v1795_v10  ;;  %2804 = vmatmul.mubr.bf16.vlgmr.msra.gmra.mxu0 %v4520_v15  ;;  %v1886_v25 = vmax.f32 %v1877_v17, 0.0  ;;  %v4252_v15 = vld [vmem:[%s4658_s5 + $0x70] sm:$0xff]   ;;  %v4262_v9 = vld [vmem:[%s4658_s5 + $0x48] sm:$0xff]   ;;  %v4264_v11 = vld [vmem:[%s4658_s5 + $0x40] sm:$0xff]  }
 0x1bb   : > { %3688 = vmatpush3.bf16.msra.mxu0 %v4251_v34  ;;  %v4263_v10 = vld [vmem:[%s4658_s5 + $0x8] sm:$0xff]   ;;  %v4265_v14 = vld [vmem:[%s4658_s5] sm:$0xff]   ;;  %v4267_v17 = vld [vmem:[%s4658_s5 + $0xb8] sm:$0xff]  }
 0x1bc   : > { %v1881_v22 = vadd.f32 %v1880_v16, %v1838_v19  ;;  %v1889_v24 = vmax.f32 %v1879_v18, 0.0  ;;  %3689 = vmatprep.subr.bf16.mxu0 %v4252_v15  ;;  %v4266_v16 = vld [vmem:[%s4658_s5 + $0xf8] sm:$0xff]   ;;  %v4268_v18 = vld [vmem:[%s4658_s5 + $0xf0] sm:$0xff]   ;;  %v4281_v34 = vld [vmem:[%s4658_s5 + $0x80] sm:$0xff]  }
 0x1bd   : > { %v4269_v19 = vld [vmem:[%s4658_s5 + $0xb0] sm:$0xff]  }
 0x1be   : > { %v1890_v27 = vmax.f32 %v1881_v22, 0.0  ;;  %v4532_v31 = vpack.c.bf16 %v1889_v24, %v1885_v28  ;;  %v4271_v22 = vld [vmem:[%s4658_s5 + $0xa8] sm:$0xff]   ;;  %v4272_v24 = vld [vmem:[%s4658_s5 + $0xe0] sm:$0xff]   ;;  %v4275_v28 = vld [vmem:[%s4658_s5 + $0x98] sm:$0xff]  }
 0x1bf   : > { %3690 = vmatpush3.bf16.msra.mxu0 %v4253_v37 }
 0x1c0   : > { %v1894_v29 = vpack.c.bf16 %v1890_v27, %v1886_v25  ;;  %3691 = vmatprep.subr.bf16.mxu0 %v4254_v38  ;;  %v4273_v25 = vld [vmem:[%s4658_s5 + $0xa0] sm:$0xff]   ;;  %v4274_v27 = vld [vmem:[%s4658_s5 + $0xd8] sm:$0xff]  }
 0x1c2   : > { %2760 = vmatprep.mubr.bf16.mxu1 %v1894_v29 }
 0x1c3   : > { %2761 = vmatmul.mubr.bf16.vlgmr.msra.gmra.mxu1 %v4532_v31  ;;  %3692 = vmatpush3.bf16.msra.mxu0 %v4255_v41 }
 0x1c4   : > { %2815 = vmatpush1.bf16.msra.mxu1 %v4202_v30  ;;  %2846 = vmatprep.mubr.bf16.mxu1 %v1894_v29  ;;  %v4276_v29 = vld [vmem:[%s4658_s5 + $0xd0] sm:$0xff]  }
 0x1c5   : > { %2816 = vmatprep.subr.bf16.mxu1 %v4207_v32  ;;  %3693 = vmatprep.subr.bf16.mxu0 %v4256_v4  ;;  %v4277_v30 = vld [vmem:[%s4658_s5 + $0x90] sm:$0xff]   ;;  %v4279_v32 = vld [vmem:[%s4658_s5 + $0x88] sm:$0xff]  }
 0x1c7   : > { %3694 = vmatpush3.bf16.msra.mxu0 %v4257_v45 }
 0x1c8   : > { %2817 = vmatpush1.bf16.msra.mxu1 %v4205_v35  ;;  %3695 = vmatprep.subr.bf16.mxu0 %v4258_v5 }
 0x1c9   : > { %2818 = vmatprep.subr.bf16.mxu1 %v4210_v36  ;;  %v2023_v36 = vld [vmem:[%s4657_s4] sm:$0xf] }
 0x1ca   : > { %v2032_v38 = vrot.slane %v2023_v36, %v541_v21 }
 0x1cb   : > { %3696 = vmatpush3.bf16.msra.mxu0 %v4259_v6 }
 0x1cc   : > { %2819 = vmatpush1.bf16.msra.mxu1 %v4208_v39  ;;  %3697 = vmatprep.subr.bf16.mxu0 %v4260_v7  ;;  %v2028_v39 = vrot.slane %v2023_v36, %v537_v42 }
 0x1cd   : > { %2820 = vmatprep.subr.bf16.mxu1 %v4213_v13 }
 0x1cf   : > { %3698 = vmatpush3.bf16.msra.mxu0 %v4261_v8 }
 0x1d0   : > { %2821 = vmatpush1.bf16.msra.mxu1 %v4211_v43  ;;  %3699 = vmatprep.subr.bf16.mxu0 %v4262_v9 }
 0x1d1   : > { %2822 = vmatprep.subr.bf16.mxu1 %v4216_v26 }
 0x1d3   : > { %3700 = vmatpush3.bf16.msra.mxu0 %v4263_v10 }
 0x1d4   : > { %2823 = vmatpush1.bf16.msra.mxu1 %v4214_v23  ;;  %3701 = vmatprep.subr.bf16.mxu0 %v4264_v11 }
 0x1d5   : > { %2824 = vmatprep.subr.bf16.mxu1 %v4219_v54 }
 0x1d7   : > { %3702 = vmatpush3.bf16.msra.mxu0 %v4265_v14 }
 0x1d8   : > { %2825 = vmatpush1.bf16.msra.mxu1 %v4217_v12 }
 0x1d9   : > { %2826 = vmatprep.subr.bf16.mxu1 %v4222_v48 }
 0x1dc   : > { %2827 = vmatpush1.bf16.msra.mxu1 %v4220_v49 }
 0x1dd   : > { %2828 = vmatprep.subr.bf16.mxu1 %v4225_v50 }
 0x1e0   : > { %2829 = vmatpush1.bf16.msra.mxu1 %v4223_v51 }
 0x1e1   : > { %2830 = vmatprep.subr.bf16.mxu1 %v4228_v44 }
 0x1e4   : > { %2831 = vmatpush2.bf16.msra.mxu1 %v4226_v52 }
 0x1e5   : > { %2832 = vmatprep.subr.bf16.mxu1 %v4231_v53 }
 0x1e8   : > { %2833 = vmatpush2.bf16.msra.mxu1 %v4229_v55 }
 0x1e9   : > { %2834 = vmatprep.subr.bf16.mxu1 %v4234_v56 }
 0x1ec   : > { %2835 = vmatpush2.bf16.msra.mxu1 %v4232_v57 }
 0x1ed   : > { %2836 = vmatprep.subr.bf16.mxu1 %v4237_v58 }
 0x1f0   : > { %2837 = vmatpush2.bf16.msra.mxu1 %v4235_v59 }
 0x1f1   : > { %2838 = vmatprep.subr.bf16.mxu1 %v4240_v60 }
 0x1f4   : > { %2839 = vmatpush2.bf16.msra.mxu1 %v4238_v61  ;;  %v2040_v61 = vrot.slane %v2023_v36, %v549_v46 }
 0x1f5   : > { %2840 = vmatprep.subr.bf16.mxu1 %v4243_v62  ;;  %v2036_v62 = vrot.slane %v2023_v36, %v545_v47 }
 0x1f8   : > { %2841 = vmatpush2.bf16.msra.mxu1 %v4241_v63 }
 0x1f9   : > { %2842 = vmatprep.subr.bf16.mxu1 %v4246_v0 }
 0x1fc   : > { %2843 = vmatpush2.bf16.msra.mxu1 %v4244_v1 }
 0x1fd   : > { %2844 = vmatprep.subr.bf16.mxu1 %v4249_v2 }
 0x200   : > { %2845 = vmatpush2.bf16.msra.mxu1 %v4247_v3 }
 0x201   : > { %3709 = vmatprep.subr.bf16.mxu1 %v4266_v16 }
 0x203   : > { %2847 = vmatmul.mubr.bf16.vlgmr.msra.gmra.mxu1 %v4532_v31  ;;  %v4278_v31 = vld [vmem:[%s4658_s5 + $0xc8] sm:$0xff]  }
 0x204   : > { %3710 = vmatpush3.bf16.msra.mxu1 %v4267_v17 }
 0x205   : > { %3711 = vmatprep.subr.bf16.mxu1 %v4268_v18 }
 0x208   : > { %3712 = vmatpush3.bf16.msra.mxu1 %v4269_v19 }
 0x209   : > { %3713 = vmatprep.subr.bf16.mxu1 %v4270_v20 }
 0x20c   : > { %3714 = vmatpush3.bf16.msra.mxu1 %v4271_v22 }
 0x20d   : > { %3715 = vmatprep.subr.bf16.mxu1 %v4272_v24 }
 0x210   : > { %3716 = vmatpush3.bf16.msra.mxu1 %v4273_v25  ;;  %v3643_v25 = vld [vmem:[%s4659_s6] ss:$0 sm:$0xff] }
 0x211   : > { %3717 = vmatprep.subr.bf16.mxu1 %v4274_v27 }
 0x214   : > { %3718 = vmatpush3.bf16.msra.mxu1 %v4275_v28 }
 0x215   : > { %3719 = vmatprep.subr.bf16.mxu1 %v4276_v29 }
 0x218   : > { %3720 = vmatpush3.bf16.msra.mxu1 %v4277_v30 }
 0x219   : > { %3721 = vmatprep.subr.bf16.mxu1 %v4278_v31 }
 0x21c   : > { %3722 = vmatpush3.bf16.msra.mxu1 %v4279_v32 }
 0x21d   : > { %3723 = vmatprep.subr.bf16.mxu1 %v4280_v33 }
 0x220   : > { %3724 = vmatpush3.bf16.msra.mxu1 %v4281_v34 }
 0x23a   : > { %v2719_v15 = vpop.f32.mrf.mxu0 }
 0x23b   : > { %v2720_v54 = vadd.f32 %v2719_v15, %v2028_v39 }
 0x23c   : > { %v2721_v35 = vpop.f32.mrf.mxu0 }
 0x23d   : > { %v2722_v26 = vadd.f32 %v2721_v35, %v2032_v38 }
 0x23e   : > { %v2723_v37 = vpop.f32.mrf.mxu0 }
 0x23f   : > { %v2724_v23 = vadd.f32 %v2723_v37, %v2028_v39 }
 0x240   : > { %v2725_v41 = vpop.f32.mrf.mxu0 }
 0x241   : > { %v2726_v48 = vadd.f32 %v2725_v41, %v2032_v38 }
 0x27a   : > { %v2805_v42 = vpop.f32.mrf.mxu0 }
 0x27b   : > { %v2806_v4 = vadd.f32 %v2805_v42, %v2036_v62 }
 0x27c   : > { %v2807_v59 = vpop.f32.mrf.mxu0 }
 0x27d   : > { %v2808_v2 = vadd.f32 %v2807_v59, %v2040_v61 }
 0x27e   : > { %v2809_v60 = vpop.f32.mrf.mxu0 }
 0x27f   : > { %v2810_v3 = vadd.f32 %v2809_v60, %v2036_v62 }
 0x280   : > { %v2811_v0 = vpop.f32.mrf.mxu0 }
 0x281   : > { %v2812_v5 = vadd.f32 %v2811_v0, %v2040_v61 }
 0x283   : > { %v2762_v13 = vpop.f32.mrf.mxu1 }
 0x284   : > { %v2763_v51 = vadd.f32 %v2762_v13, %v2720_v54 }
 0x285   : > { %v2764_v43 = vpop.f32.mrf.mxu1 }
 0x286   : > { %v2765_v49 = vadd.f32 %v2764_v43, %v2722_v26  ;;  %v2857_v21 = vmax.f32 %v2763_v51, 0.0 }
 0x287   : > { %v2766_v12 = vpop.f32.mrf.mxu1 }
 0x288   : > { %v2767_v50 = vadd.f32 %v2766_v12, %v2724_v23  ;;  %v2858_v55 = vmax.f32 %v2765_v49, 0.0 }
 0x289   : > { %v2768_v44 = vpop.f32.mrf.mxu1 }
 0x28a   : > { %v2769_v52 = vadd.f32 %v2768_v44, %v2726_v48  ;;  %v2861_v53 = vmax.f32 %v2767_v50, 0.0 }
 0x28c   : > { %v2862_v56 = vmax.f32 %v2769_v52, 0.0  ;;  %v2865_v58 = vpack.c.bf16 %v2861_v53, %v2857_v21 }
 0x28e   : > { %v2866_v57 = vpack.c.bf16 %v2862_v56, %v2858_v55 }
 0x290   : > { %3164 = vmatprep.mubr.bf16.mxu0 %v2866_v57 }
 0x291   : > { %3165 = vmatmul.mubr.bf16.vlgmr.msra.gmra.mxu0 %v2865_v58 }
 0x2c3   : > { %v2848_v63 = vpop.f32.mrf.mxu1 }
 0x2c4   : > { %v2849_v8 = vadd.f32 %v2848_v63, %v2806_v4 }
 0x2c5   : > { %v2850_v1 = vpop.f32.mrf.mxu1 }
 0x2c6   : > { %v2851_v6 = vadd.f32 %v2850_v1, %v2808_v2  ;;  %v2859_v46 = vmax.f32 %v2849_v8, 0.0 }
 0x2c7   : > { %v2852_v45 = vpop.f32.mrf.mxu1 }
 0x2c8   : > { %v2853_v7 = vadd.f32 %v2852_v45, %v2810_v3  ;;  %v2860_v14 = vmax.f32 %v2851_v6, 0.0 }
 0x2c9   : > { %v2854_v9 = vpop.f32.mrf.mxu1 }
 0x2ca   : > { %v2855_v10 = vadd.f32 %v2854_v9, %v2812_v5  ;;  %v2863_v11 = vmax.f32 %v2853_v7, 0.0 }
 0x2cc   : > { %v2864_v16 = vmax.f32 %v2855_v10, 0.0  ;;  %v2867_v40 = vpack.c.bf16 %v2863_v11, %v2859_v46 }
 0x2ce   : > { %v2868_v17 = vpack.c.bf16 %v2864_v16, %v2860_v14 }
 0x2d0   : > { %3205 = vmatprep.mubr.bf16.mxu1 %v2868_v17 }
 0x2d1   : > { %3206 = vmatmul.mubr.bf16.vlgmr.msra.gmra.mxu1 %v2867_v40 }
 0x351   : > { %v3703_v47 = vpop.f32.mrf.mxu0 }
 0x353   : > { %v3704_v18 = vpop.f32.mrf.mxu0 }
 0x354   : > { %v3705_v24 = vadd.f32 %v3704_v18, %v3703_v47 }
 0x355   : > { %v3706_v19 = vpop.f32.mrf.mxu0 }
 0x356   : > { %v3167_v31 = vadd.f32 %v3705_v24, %v3643_v25 }
 0x357   : > { %v3707_v20 = vpop.f32.mrf.mxu0 }
 0x358   : > { %v3708_v28 = vadd.f32 %v3707_v20, %v3706_v19 }
 0x35a   : > { %v3170_v33 = vadd.f32 %v3708_v28, %v3643_v25 }
 0x391   : > { %v3725_v22 = vpop.f32.mrf.mxu1 }
 0x393   : > { %v3726_v27 = vpop.f32.mrf.mxu1 }
 0x394   : > { %v3727_v29 = vadd.f32 %v3726_v27, %v3725_v22 }
 0x395   : > { %v3728_v30 = vpop.f32.mrf.mxu1 }
 0x396   : > { %v3208_v34 = vadd.f32 %v3727_v29, %v3167_v31 }
 0x397   : > { %v3729_v32 = vpop.f32.mrf.mxu1 }
 0x398   : > { %v3730_v15 = vadd.f32 %v3729_v32, %v3728_v30  ;;  %v3214_v36 = vmax.f32 %v3208_v34, 0.0 }
 0x39a   : > { %v3211_v35 = vadd.f32 %v3730_v15, %v3170_v33 }
 0x39c   : > { %v3215_v37 = vmax.f32 %v3211_v35, 0.0 }
 0x39e   : > { %v3685_v38 = vpack.c.bf16 %v3215_v37, %v3214_v36 }
 0x3a0   : > { %3686 = vst [vmem:[%s313_s11] sm:$0xff] %v3685_v38  }
 0x3a1 PF: > { %s19_s24 = sadd.s32 1, %s4348_s24  }
 0x3a2   : > { %p16_p3 = scmp.ge.s32.totalorder %s19_s24, 4  }
 0x3a4   :  { %18 = sbr.rel (!%p16_p3) target bundleno = 2 (0x2), region = 87 }
 0x3a9   :  { %3248 = vsyncpa [#allocation3], 1 }
 0x3aa   :  { %3250 = vsyncpa [#allocation3 + $0x1], 1 }
 0x3ab   :  { %3251 = vsyncpa [#allocation5], 1 }

</bundles_post_ra>
